<compile_context>
chip_gen: v7x
topology: tpu7x:2x2x1
jax: 0.10.0
libtpu: 0.0.40
codegen_flags: <defaults>
</compile_context>

<pallas_src>
import functools

import jax
import jax.numpy as jnp
from jax import lax
from jax.experimental import pallas as pl
from jax.experimental.pallas import tpu as pltpu


def _silu(v):
    return v * jax.nn.sigmoid(v)


def sconv_chunk_kernel(
    x_ref, wf_ref, bf_ref, wy_ref, by_ref, nega_ref,
    gnw_ref, gnb_ref, csmT_ref, addm_ref, hid_init_ref,
    y_ref, hid_out_ref, hid_scratch, *, num_head,
):
    c = pl.program_id(1)

    @pl.when(c == 0)
    def _():
        hid_scratch[...] = hid_init_ref[...]

    f32 = jnp.float32
    bf16 = jnp.bfloat16

    x = x_ref[...]                                   # (Bt, C, D) bf16
    Bt, C, D = x.shape
    H = num_head
    I = D // H
    G = Bt * H

    x2 = x.reshape(Bt * C, D)

    # One fused MXU pass for all four x-side projections: [z | z_act | y_act | dt].
    proj = jnp.dot(x2, wf_ref[...], preferred_element_type=f32) + bf_ref[...]
    z = proj[:, :D] * _silu(proj[:, D:2 * D])        # (Bt*C, D) f32
    y_gate = _silu(proj[:, 2 * D:3 * D])             # (Bt*C, D) f32
    dt = proj[:, 3 * D:3 * D + H]                    # (Bt*C, H)

    # ln_da = -exp(ln_a) * softplus(fc_dt(x))
    ln_da = nega_ref[...] * jax.nn.softplus(dt)      # (Bt*C, H)

    # Inclusive in-chunk cumsum for ALL (batch, head) pairs via one 2-D matmul:
    #   cs[g, l] = sum_{m <= l} ln_da[g, m],   g = b*H + h
    lnda_g = jnp.transpose(ln_da.reshape(Bt, C, H), (0, 2, 1)).reshape(G, C)
    cs = jnp.dot(lnda_g, csmT_ref[...], preferred_element_type=f32)   # (G, C)

    cs_row = cs.reshape(G, 1, C)                     # (G, 1, C)
    cs_col = jnp.transpose(cs_row, (0, 2, 1))        # (G, C, 1)

    # decay[g, l, m] = exp(cs_l - cs_m) for m <= l, else 0 (masked BEFORE exp).
    decay = jnp.exp(cs_col - cs_row + addm_ref[...][None, :, :])      # (G, C, C)

    # Head-major z: (G, C, I).
    z_g = jnp.stack(
        [z[:, h * I:(h + 1) * I].reshape(Bt, C, I) for h in range(H)],
        axis=1).reshape(G, C, I)

    # In-chunk contribution (single batched MXU contraction) + cross-chunk term.
    h_inner = jnp.einsum('glm,gmi->gli', decay, z_g,
                         preferred_element_type=f32)                  # (G, C, I)
    h_all = h_inner + jnp.exp(cs_col) * hid_scratch[...]              # (G, C, I)

    hid_next = h_all[:, C - 1:C, :]                                   # (G, 1, I)
    hid_scratch[...] = hid_next

    @pl.when(c == pl.num_programs(1) - 1)
    def _():
        hid_out_ref[...] = hid_next

    # GroupNorm(num_head, num_head): normalize over inner dim per (b, l, head).
    mu = jnp.mean(h_all, axis=-1, keepdims=True)
    var = jnp.mean((h_all - mu) * (h_all - mu), axis=-1, keepdims=True)
    h_norm = (h_all - mu) * lax.rsqrt(var + 1e-5)
    h_norm = (h_norm * gnw_ref[...] + gnb_ref[...]).astype(bf16)      # (G, C, I)

    # Back to (rows=(b,c), cols=(h,i)) for fc_y (relayout done in bf16).
    hn4 = h_norm.reshape(Bt, H, C, I)
    hn2 = jnp.concatenate(
        [hn4[:, h].reshape(Bt * C, I) for h in range(H)], axis=-1)    # (Bt*C, D) bf16

    y = (jnp.dot(hn2, wy_ref[...], preferred_element_type=f32)
         + by_ref[...]) * y_gate
    y_ref[...] = y.reshape(Bt, C, D)


def chunkwise_sconv_forward(x, p, num_head, chunk_size, batch_tile=1):
    B, S, D = x.shape
    H = num_head
    I = D // H
    C = chunk_size
    Bt = batch_tile
    # TODO(synk): torch.split allows a ragged final chunk; kernel needs S % chunk_size == 0.
    assert S % C == 0 and B % Bt == 0 and D % H == 0
    n_chunks = S // C
    f32, bf16 = jnp.float32, jnp.bfloat16

    # Fused x-side projection weights: [wz | wza | wya | wdt] -> bf16, one MXU pass.
    w_fused = jnp.concatenate([p["wz"], p["wza"], p["wya"], p["wdt"]], axis=1).astype(bf16)
    b_fused = jnp.concatenate([p["bz"], p["bza"], p["bya"], p["bdt"]], axis=1).astype(f32)
    wy = p["wy"].astype(bf16)
    by = p["by"].astype(f32)

    neg_exp_ln_a = (-jnp.exp(p["ln_a"])).astype(f32)                 # (1, H)

    # GroupNorm params, head-major, pre-broadcast over inner dim and batch tile.
    gnw = jnp.tile(jnp.repeat(p["gn_w"], I).reshape(H, 1, I), (Bt, 1, 1)).astype(f32)
    gnb = jnp.tile(jnp.repeat(p["gn_b"], I).reshape(H, 1, I), (Bt, 1, 1)).astype(f32)

    # Causal masks, hoisted out of the kernel (static per chunk_size).
    tri = jnp.tril(jnp.ones((C, C), f32))            # tri[l, m] = 1 iff m <= l
    cs_maskT = tri.T                                 # (m, l)
    addmask = jnp.where(tri > 0, 0.0, -1e30).astype(f32)

    hid_init = jnp.broadcast_to(
        p["last_hidden_init"].reshape(1, H, 1, I), (B, H, 1, I)
    ).astype(f32).reshape(B * H, 1, I)

    x_bf = x.astype(bf16)

    def res(shape):  # resident (constant-index) full-array block
        return pl.BlockSpec(shape, lambda b, c, _n=len(shape): (0,) * _n)

    kernel = functools.partial(sconv_chunk_kernel, num_head=H)

    y, hid = pl.pallas_call(
        kernel,
        out_shape=(jax.ShapeDtypeStruct((B, S, D), f32),
                   jax.ShapeDtypeStruct((B * H, 1, I), f32)),
        grid_spec=pltpu.PrefetchScalarGridSpec(
            num_scalar_prefetch=0,
            grid=(B // Bt, n_chunks),
            in_specs=[
                pl.BlockSpec((Bt, C, D), lambda b, c: (b, c, 0)),     # x chunk
                res((D, 3 * D + H)), res((1, 3 * D + H)),             # fused proj
                res((D, D)), res((1, D)),                             # fc_y
                res((1, H)),                                          # -exp(ln_a)
                res((Bt * H, 1, I)), res((Bt * H, 1, I)),             # GroupNorm gamma/beta
                res((C, C)), res((C, C)),                             # cumsum maskT, additive mask
                pl.BlockSpec((Bt * H, 1, I), lambda b, c: (b, 0, 0)), # initial hidden
            ],
            out_specs=(pl.BlockSpec((Bt, C, D), lambda b, c: (b, c, 0)),
                       pl.BlockSpec((Bt * H, 1, I), lambda b, c: (b, 0, 0))),
            scratch_shapes=[pltpu.VMEM((Bt * H, 1, I), f32)],
        ),
        compiler_params=pltpu.CompilerParams(
            dimension_semantics=("parallel", "arbitrary"),
            vmem_limit_bytes=64 * 1024 * 1024,
        ),
    )(x_bf, w_fused, b_fused, wy, by, neg_exp_ln_a, gnw, gnb,
      cs_maskT, addmask, hid_init)

    return y, hid.reshape(B, H, I)


def init_params(key, dim, num_head):
    inner = dim // num_head
    ks = jax.random.split(key, 8)

    def xavier(k, fan_in, fan_out, gain=0.01):
        std = gain * (2.0 / (fan_in + fan_out)) ** 0.5
        return std * jax.random.normal(k, (fan_in, fan_out), jnp.float32)

    p = {}
    p["wz"] = xavier(ks[0], dim, dim)
    p["bz"] = jnp.zeros((1, dim), jnp.float32)
    p["wza"] = xavier(ks[1], dim, dim)
    p["bza"] = jnp.zeros((1, dim), jnp.float32)
    p["wy"] = xavier(ks[2], dim, dim)
    p["by"] = jnp.zeros((1, dim), jnp.float32)
    p["wya"] = xavier(ks[3], dim, dim)
    p["bya"] = jnp.zeros((1, dim), jnp.float32)
    p["wdt"] = xavier(ks[4], dim, num_head)
    dt = jnp.exp(jax.random.uniform(ks[5], (num_head,), jnp.float32,
                                    minval=jnp.log(0.001), maxval=jnp.log(0.1)))
    p["bdt"] = (dt + jnp.log1p(-jnp.exp(-dt))).reshape(1, num_head)
    p["ln_a"] = jnp.log(jax.random.uniform(ks[6], (num_head,), jnp.float32,
                                           minval=1.0, maxval=16.0)).reshape(1, num_head)
    p["gn_w"] = jnp.ones((num_head,), jnp.float32)
    p["gn_b"] = jnp.zeros((num_head,), jnp.float32)
    p["last_hidden_init"] = jax.random.normal(ks[7], (num_head, inner), jnp.float32)
    return p


def _mm_bf16(a, w, b):
    # Same precision as the kernel: bf16 operands, f32 accumulation.
    return jnp.dot(a.astype(jnp.bfloat16), w.astype(jnp.bfloat16),
                   preferred_element_type=jnp.float32) + b


def reference_forward(x, p, num_head, chunk_size):
    """Pure-JAX transcription of the PyTorch forward (bf16 matmuls like the kernel)."""
    B, S, D = x.shape
    inner = D // num_head
    hidden = jnp.broadcast_to(p["last_hidden_init"][None], (B, num_head, inner))
    outs = []
    for c0 in range(0, S, chunk_size):
        xc = x[:, c0:c0 + chunk_size]
        L = xc.shape[1]
        z = _mm_bf16(xc, p["wz"], p["bz"]) * jax.nn.silu(_mm_bf16(xc, p["wza"], p["bza"]))
        z = z.reshape(B, L, num_head, inner)
        ln_da = -jnp.exp(p["ln_a"]) * jax.nn.softplus(_mm_bf16(xc, p["wdt"], p["bdt"]))
        rep = jnp.broadcast_to(jnp.transpose(ln_da, (0, 2, 1))[:, :, :, None],
                               (B, num_head, L, L))
        masked = rep * jnp.tril(jnp.ones((L, L), jnp.float32), -1)
        da = jnp.exp(jnp.cumsum(masked, axis=2)) * jnp.tril(jnp.ones((L, L), jnp.float32))
        h_in = jnp.einsum("bhlm,bmhi->blhi", da, z)
        cs = jnp.cumsum(ln_da, axis=1)
        h_cr = jnp.einsum("blh,bhi->blhi", jnp.exp(cs), hidden)
        h = h_in + h_cr
        hidden = h[:, -1]
        mu = jnp.mean(h, axis=-1, keepdims=True)
        var = jnp.mean((h - mu) ** 2, axis=-1, keepdims=True)
        h_norm = (h - mu) / jnp.sqrt(var + 1e-5)
        h_norm = h_norm * p["gn_w"][None, None, :, None] + p["gn_b"][None, None, :, None]
        h_norm = h_norm.reshape(B, L, D)
        y = _mm_bf16(h_norm, p["wy"], p["by"]) * jax.nn.silu(_mm_bf16(xc, p["wya"], p["bya"]))
        outs.append(y)
    return jnp.concatenate(outs, axis=1), hidden


if __name__ == "__main__":
    key = jax.random.PRNGKey(0)
    kx, kp = jax.random.split(key)
    B, S, D, H, CS = 2, 16, 32, 4, 8   # batch, seq, dim, num_head, chunk_size

    x = jax.random.normal(kx, (B, S, D), dtype=jnp.float32)
    params = init_params(kp, D, H)

    y, hid = chunkwise_sconv_forward(x, params, H, CS, batch_tile=1)
    y = jax.block_until_ready(y)
    hid = jax.block_until_ready(hid)

    y_ref, hid_ref = reference_forward(x, params, H, CS)
    assert jnp.allclose(y, y_ref, rtol=5e-3, atol=1e-6), \
        float(jnp.max(jnp.abs(y - y_ref)))
    assert jnp.allclose(hid, hid_ref, rtol=5e-3, atol=1e-4), \
        float(jnp.max(jnp.abs(hid - hid_ref)))
    print("KERNEL_OK")
</pallas_src>

<mosaic_0001>
module attributes {stable_mosaic.version = 11 : i64} {
  func.func @sconv_chunk_kernel(%arg0: i32, %arg1: i32, %arg2: memref<1x8x32xbf16, #tpu.memory_space<vmem>>, %arg3: memref<32x100xbf16, #tpu.memory_space<vmem>>, %arg4: memref<1x100xf32, #tpu.memory_space<vmem>>, %arg5: memref<32x32xbf16, #tpu.memory_space<vmem>>, %arg6: memref<1x32xf32, #tpu.memory_space<vmem>>, %arg7: memref<1x4xf32, #tpu.memory_space<vmem>>, %arg8: memref<4x1x8xf32, #tpu.memory_space<vmem>>, %arg9: memref<4x1x8xf32, #tpu.memory_space<vmem>>, %arg10: memref<8x8xf32, #tpu.memory_space<vmem>>, %arg11: memref<8x8xf32, #tpu.memory_space<vmem>>, %arg12: memref<4x1x8xf32, #tpu.memory_space<vmem>>, %arg13: memref<1x8x32xf32, #tpu.memory_space<vmem>>, %arg14: memref<4x1x8xf32, #tpu.memory_space<vmem>>, %arg15: memref<4x1x8xf32, #tpu.memory_space<vmem>>) attributes {dimension_semantics = [#tpu.dimension_semantics<parallel>, #tpu.dimension_semantics<arbitrary>], iteration_bounds = array<i64: 2, 2>, scalar_prefetch = 0 : i64, scratch_operands = 1 : i64, tpu.core_type = #tpu.core_type<tc>, window_params = [{transform_indices = @transform_0, window_bounds = array<i64: 1, 8, 32>}, {pipeline_mode = #tpu.pipeline_mode<synchronous>, transform_indices = @transform_1, window_bounds = array<i64: 32, 100>}, {pipeline_mode = #tpu.pipeline_mode<synchronous>, transform_indices = @transform_2, window_bounds = array<i64: 1, 100>}, {pipeline_mode = #tpu.pipeline_mode<synchronous>, transform_indices = @transform_3, window_bounds = array<i64: 32, 32>}, {pipeline_mode = #tpu.pipeline_mode<synchronous>, transform_indices = @transform_4, window_bounds = array<i64: 1, 32>}, {pipeline_mode = #tpu.pipeline_mode<synchronous>, transform_indices = @transform_5, window_bounds = array<i64: 1, 4>}, {pipeline_mode = #tpu.pipeline_mode<synchronous>, transform_indices = @transform_6, window_bounds = array<i64: 4, 1, 8>}, {pipeline_mode = #tpu.pipeline_mode<synchronous>, transform_indices = @transform_7, window_bounds = array<i64: 4, 1, 8>}, {pipeline_mode = #tpu.pipeline_mode<synchronous>, transform_indices = @transform_8, window_bounds = array<i64: 8, 8>}, {pipeline_mode = #tpu.pipeline_mode<synchronous>, transform_indices = @transform_9, window_bounds = array<i64: 8, 8>}, {transform_indices = @transform_10, window_bounds = array<i64: 4, 1, 8>}, {transform_indices = @transform_11, window_bounds = array<i64: 1, 8, 32>}, {transform_indices = @transform_12, window_bounds = array<i64: 4, 1, 8>}]} {
    %c0_i32 = arith.constant 0 : i32
    %0 = arith.cmpi eq, %arg1, %c0_i32 : i32
    %1 = arith.extui %0 : i1 to i32
    %c0_i32_0 = arith.constant 0 : i32
    %2 = arith.cmpi ne, %1, %c0_i32_0 : i32
    scf.if %2 {
      %c0_45 = arith.constant 0 : index
      %c0_46 = arith.constant 0 : index
      %c0_47 = arith.constant 0 : index
      %134 = vector.load %arg12[%c0_45, %c0_46, %c0_47] : memref<4x1x8xf32, #tpu.memory_space<vmem>>, vector<4x1x8xf32>
      %c0_48 = arith.constant 0 : index
      %c0_49 = arith.constant 0 : index
      %c0_50 = arith.constant 0 : index
      %135 = vector.load %arg15[%c0_48, %c0_49, %c0_50] : memref<4x1x8xf32, #tpu.memory_space<vmem>>, vector<4x1x8xf32>
      tpu.vector_store %arg15[%c0_48, %c0_49, %c0_50], %134 {strides = array<i32>} : memref<4x1x8xf32, #tpu.memory_space<vmem>>, vector<4x1x8xf32>,
    } else {
    }
    %c0 = arith.constant 0 : index
    %c0_1 = arith.constant 0 : index
    %c0_2 = arith.constant 0 : index
    %3 = vector.load %arg2[%c0, %c0_1, %c0_2] : memref<1x8x32xbf16, #tpu.memory_space<vmem>>, vector<1x8x32xbf16>
    %4 = vector.shape_cast %3 : vector<1x8x32xbf16> to vector<8x32xbf16>
    %c0_3 = arith.constant 0 : index
    %c0_4 = arith.constant 0 : index
    %5 = vector.load %arg3[%c0_3, %c0_4] : memref<32x100xbf16, #tpu.memory_space<vmem>>, vector<32x100xbf16>
    %cst = arith.constant dense<0.000000e+00> : vector<8x100xf32>
    %6 = tpu.matmul %4, %5, %cst {dimension_numbers = #tpu.dot_dimension_numbers<[1], [0], [0], [1], [0, 0, 1, 1], [], []>} : vector<8x32xbf16>, vector<32x100xbf16>, vector<8x100xf32> -> vector<8x100xf32>
    %c0_5 = arith.constant 0 : index
    %c0_6 = arith.constant 0 : index
    %7 = vector.load %arg4[%c0_5, %c0_6] : memref<1x100xf32, #tpu.memory_space<vmem>>, vector<1x100xf32>
    %8 = vector.broadcast %7 : vector<1x100xf32> to vector<8x100xf32>
    %9 = arith.addf %6, %8 : vector<8x100xf32>
    %10 = vector.extract_strided_slice %9 {offsets = [0, 0], sizes = [8, 32], strides = [1, 1]} : vector<8x100xf32> to vector<8x32xf32>
    %11 = vector.extract_strided_slice %9 {offsets = [0, 32], sizes = [8, 32], strides = [1, 1]} : vector<8x100xf32> to vector<8x32xf32>
    %12 = arith.negf %11 : vector<8x32xf32>
    %13 = math.exp %12 : vector<8x32xf32>
    %cst_7 = arith.constant 1.000000e+00 : f32
    %14 = vector.broadcast %cst_7 : f32 to vector<8x32xf32>
    %15 = arith.addf %14, %13 : vector<8x32xf32>
    %16 = arith.divf %14, %15 : vector<8x32xf32>
    %17 = arith.mulf %11, %16 : vector<8x32xf32>
    %18 = arith.mulf %10, %17 : vector<8x32xf32>
    %19 = vector.extract_strided_slice %9 {offsets = [0, 64], sizes = [8, 32], strides = [1, 1]} : vector<8x100xf32> to vector<8x32xf32>
    %20 = arith.negf %19 : vector<8x32xf32>
    %21 = math.exp %20 : vector<8x32xf32>
    %cst_8 = arith.constant 1.000000e+00 : f32
    %22 = vector.broadcast %cst_8 : f32 to vector<8x32xf32>
    %23 = arith.addf %22, %21 : vector<8x32xf32>
    %24 = arith.divf %22, %23 : vector<8x32xf32>
    %25 = arith.mulf %19, %24 : vector<8x32xf32>
    %26 = vector.extract_strided_slice %9 {offsets = [0, 96], sizes = [8, 4], strides = [1, 1]} : vector<8x100xf32> to vector<8x4xf32>
    %c0_9 = arith.constant 0 : index
    %c0_10 = arith.constant 0 : index
    %27 = vector.load %arg7[%c0_9, %c0_10] : memref<1x4xf32, #tpu.memory_space<vmem>>, vector<1x4xf32>
    %cst_11 = arith.constant 0.000000e+00 : f32
    %28 = vector.broadcast %cst_11 : f32 to vector<8x4xf32>
    %29 = arith.maximumf %26, %28 : vector<8x4xf32>
    %30 = vector.broadcast %cst_11 : f32 to vector<8x4xf32>
    %31 = arith.subf %26, %30 : vector<8x4xf32>
    %32 = arith.cmpf one, %31, %31 : vector<8x4xf32>
    %33 = vector.broadcast %cst_11 : f32 to vector<8x4xf32>
    %34 = arith.addf %26, %33 : vector<8x4xf32>
    %35 = math.absf %31 : vector<8x4xf32>
    %cst_12 = arith.constant 0.000000e+00 : f32
    %36 = vector.broadcast %cst_12 : f32 to vector<8x4xf32>
    %37 = arith.subf %36, %35 : vector<8x4xf32>
    %38 = math.exp %37 : vector<8x4xf32>
    %39 = math.log1p %38 : vector<8x4xf32>
    %40 = arith.addf %29, %39 : vector<8x4xf32>
    %41 = arith.select %32, %34, %40 : vector<8x4xi1>, vector<8x4xf32>
    %42 = vector.broadcast %27 : vector<1x4xf32> to vector<8x4xf32>
    %43 = arith.mulf %42, %41 : vector<8x4xf32>
    %44 = vector.shape_cast %43 : vector<8x4xf32> to vector<1x8x4xf32>
    %45 = tpu.transpose %44, [0, 2, 1] : vector<1x8x4xf32> -> vector<1x4x8xf32>
    %46 = vector.shape_cast %45 : vector<1x4x8xf32> to vector<4x8xf32>
    %c0_13 = arith.constant 0 : index
    %c0_14 = arith.constant 0 : index
    %47 = vector.load %arg10[%c0_13, %c0_14] : memref<8x8xf32, #tpu.memory_space<vmem>>, vector<8x8xf32>
    %cst_15 = arith.constant dense<0.000000e+00> : vector<4x8xf32>
    %48 = tpu.matmul %46, %47, %cst_15 {dimension_numbers = #tpu.dot_dimension_numbers<[1], [0], [0], [1], [0, 0, 1, 1], [], []>} : vector<4x8xf32>, vector<8x8xf32>, vector<4x8xf32> -> vector<4x8xf32>
    %49 = vector.shape_cast %48 : vector<4x8xf32> to vector<4x1x8xf32>
    %50 = tpu.transpose %49, [0, 2, 1] : vector<4x1x8xf32> -> vector<4x8x1xf32>
    %51 = vector.broadcast %50 : vector<4x8x1xf32> to vector<4x8x8xf32>
    %52 = vector.broadcast %49 : vector<4x1x8xf32> to vector<4x8x8xf32>
    %53 = arith.subf %51, %52 : vector<4x8x8xf32>
    %c0_16 = arith.constant 0 : index
    %c0_17 = arith.constant 0 : index
    %54 = vector.load %arg11[%c0_16, %c0_17] : memref<8x8xf32, #tpu.memory_space<vmem>>, vector<8x8xf32>
    %55 = vector.shape_cast %54 : vector<8x8xf32> to vector<1x8x8xf32>
    %56 = vector.broadcast %55 : vector<1x8x8xf32> to vector<4x8x8xf32>
    %57 = arith.addf %53, %56 : vector<4x8x8xf32>
    %58 = math.exp %57 : vector<4x8x8xf32>
    %59 = vector.extract_strided_slice %18 {offsets = [0, 0], sizes = [8, 8], strides = [1, 1]} : vector<8x32xf32> to vector<8x8xf32>
    %60 = vector.shape_cast %59 : vector<8x8xf32> to vector<1x8x8xf32>
    %61 = vector.extract_strided_slice %18 {offsets = [0, 8], sizes = [8, 8], strides = [1, 1]} : vector<8x32xf32> to vector<8x8xf32>
    %62 = vector.shape_cast %61 : vector<8x8xf32> to vector<1x8x8xf32>
    %63 = vector.extract_strided_slice %18 {offsets = [0, 16], sizes = [8, 8], strides = [1, 1]} : vector<8x32xf32> to vector<8x8xf32>
    %64 = vector.shape_cast %63 : vector<8x8xf32> to vector<1x8x8xf32>
    %65 = vector.extract_strided_slice %18 {offsets = [0, 24], sizes = [8, 8], strides = [1, 1]} : vector<8x32xf32> to vector<8x8xf32>
    %66 = vector.shape_cast %65 : vector<8x8xf32> to vector<1x8x8xf32>
    %67 = vector.shape_cast %60 : vector<1x8x8xf32> to vector<1x1x8x8xf32>
    %68 = vector.shape_cast %62 : vector<1x8x8xf32> to vector<1x1x8x8xf32>
    %69 = vector.shape_cast %64 : vector<1x8x8xf32> to vector<1x1x8x8xf32>
    %70 = vector.shape_cast %66 : vector<1x8x8xf32> to vector<1x1x8x8xf32>
    %71 = tpu.concatenate %67, %68, %69, %70 in 1 : vector<1x1x8x8xf32>, vector<1x1x8x8xf32>, vector<1x1x8x8xf32>, vector<1x1x8x8xf32> -> vector<1x4x8x8xf32>
    %72 = vector.shape_cast %71 : vector<1x4x8x8xf32> to vector<4x8x8xf32>
    "tpu.trace_start"() <{level = 10 : i32, message = "glm,gmi->gli"}> : () -> ()
    %cst_18 = arith.constant dense<0.000000e+00> : vector<4x8x8xf32>
    %73 = tpu.matmul %58, %72, %cst_18 {dimension_numbers = #tpu.dot_dimension_numbers<[2], [1], [1], [2], [0, 0, 0, 1, 1, 2], [0], [0]>} : vector<4x8x8xf32>, vector<4x8x8xf32>, vector<4x8x8xf32> -> vector<4x8x8xf32>
    "tpu.trace_stop"() : () -> ()
    %74 = math.exp %50 : vector<4x8x1xf32>
    %c0_19 = arith.constant 0 : index
    %c0_20 = arith.constant 0 : index
    %c0_21 = arith.constant 0 : index
    %75 = vector.load %arg15[%c0_19, %c0_20, %c0_21] : memref<4x1x8xf32, #tpu.memory_space<vmem>>, vector<4x1x8xf32>
    %76 = vector.broadcast %74 : vector<4x8x1xf32> to vector<4x8x8xf32>
    %77 = vector.broadcast %75 : vector<4x1x8xf32> to vector<4x8x8xf32>
    %78 = arith.mulf %76, %77 : vector<4x8x8xf32>
    %79 = arith.addf %73, %78 : vector<4x8x8xf32>
    %80 = vector.extract_strided_slice %79 {offsets = [0, 7, 0], sizes = [4, 1, 8], strides = [1, 1, 1]} : vector<4x8x8xf32> to vector<4x1x8xf32>
    %c0_22 = arith.constant 0 : index
    %c0_23 = arith.constant 0 : index
    %c0_24 = arith.constant 0 : index
    %81 = vector.load %arg15[%c0_22, %c0_23, %c0_24] : memref<4x1x8xf32, #tpu.memory_space<vmem>>, vector<4x1x8xf32>
    tpu.vector_store %arg15[%c0_22, %c0_23, %c0_24], %80 {strides = array<i32>} : memref<4x1x8xf32, #tpu.memory_space<vmem>>, vector<4x1x8xf32>,
    %c1_i32 = arith.constant 1 : i32
    %82 = arith.cmpi eq, %arg1, %c1_i32 : i32
    %83 = arith.extui %82 : i1 to i32
    %c0_i32_25 = arith.constant 0 : i32
    %84 = arith.cmpi ne, %83, %c0_i32_25 : i32
    scf.if %84 {
      %c0_45 = arith.constant 0 : index
      %c0_46 = arith.constant 0 : index
      %c0_47 = arith.constant 0 : index
      %134 = vector.load %arg14[%c0_45, %c0_46, %c0_47] : memref<4x1x8xf32, #tpu.memory_space<vmem>>, vector<4x1x8xf32>
      tpu.vector_store %arg14[%c0_45, %c0_46, %c0_47], %80 {strides = array<i32>} : memref<4x1x8xf32, #tpu.memory_space<vmem>>, vector<4x1x8xf32>,
    } else {
    }
    %cst_26 = arith.constant dense<0.000000e+00> : vector<4x8xf32>
    %85 = vector.multi_reduction <add>, %79, %cst_26 [2] : vector<4x8x8xf32> to vector<4x8xf32>
    %86 = vector.shape_cast %85 : vector<4x8xf32> to vector<4x8x1xf32>
    %cst_27 = arith.constant 8.000000e+00 : f32
    %87 = vector.broadcast %cst_27 : f32 to vector<4x8x1xf32>
    %88 = arith.divf %86, %87 : vector<4x8x1xf32>
    %89 = vector.broadcast %88 : vector<4x8x1xf32> to vector<4x8x8xf32>
    %90 = arith.subf %79, %89 : vector<4x8x8xf32>
    %91 = vector.broadcast %88 : vector<4x8x1xf32> to vector<4x8x8xf32>
    %92 = arith.subf %79, %91 : vector<4x8x8xf32>
    %93 = arith.mulf %90, %92 : vector<4x8x8xf32>
    %cst_28 = arith.constant dense<0.000000e+00> : vector<4x8xf32>
    %94 = vector.multi_reduction <add>, %93, %cst_28 [2] : vector<4x8x8xf32> to vector<4x8xf32>
    %95 = vector.shape_cast %94 : vector<4x8xf32> to vector<4x8x1xf32>
    %cst_29 = arith.constant 8.000000e+00 : f32
    %96 = vector.broadcast %cst_29 : f32 to vector<4x8x1xf32>
    %97 = arith.divf %95, %96 : vector<4x8x1xf32>
    %98 = vector.broadcast %88 : vector<4x8x1xf32> to vector<4x8x8xf32>
    %99 = arith.subf %79, %98 : vector<4x8x8xf32>
    %cst_30 = arith.constant 9.99999974E-6 : f32
    %100 = vector.broadcast %cst_30 : f32 to vector<4x8x1xf32>
    %101 = arith.addf %97, %100 : vector<4x8x1xf32>
    %102 = math.rsqrt %101 : vector<4x8x1xf32>
    %103 = vector.broadcast %102 : vector<4x8x1xf32> to vector<4x8x8xf32>
    %104 = arith.mulf %99, %103 : vector<4x8x8xf32>
    %c0_31 = arith.constant 0 : index
    %c0_32 = arith.constant 0 : index
    %c0_33 = arith.constant 0 : index
    %105 = vector.load %arg8[%c0_31, %c0_32, %c0_33] : memref<4x1x8xf32, #tpu.memory_space<vmem>>, vector<4x1x8xf32>
    %106 = vector.broadcast %105 : vector<4x1x8xf32> to vector<4x8x8xf32>
    %107 = arith.mulf %104, %106 : vector<4x8x8xf32>
    %c0_34 = arith.constant 0 : index
    %c0_35 = arith.constant 0 : index
    %c0_36 = arith.constant 0 : index
    %108 = vector.load %arg9[%c0_34, %c0_35, %c0_36] : memref<4x1x8xf32, #tpu.memory_space<vmem>>, vector<4x1x8xf32>
    %109 = vector.broadcast %108 : vector<4x1x8xf32> to vector<4x8x8xf32>
    %110 = arith.addf %107, %109 : vector<4x8x8xf32>
    %111 = arith.truncf %110 : vector<4x8x8xf32> to vector<4x8x8xbf16>
    %112 = vector.shape_cast %111 : vector<4x8x8xbf16> to vector<1x4x8x8xbf16>
    %113 = vector.extract_strided_slice %112 {offsets = [0, 0, 0, 0], sizes = [1, 1, 8, 8], strides = [1, 1, 1, 1]} : vector<1x4x8x8xbf16> to vector<1x1x8x8xbf16>
    %114 = vector.shape_cast %113 : vector<1x1x8x8xbf16> to vector<1x8x8xbf16>
    %115 = vector.shape_cast %114 : vector<1x8x8xbf16> to vector<8x8xbf16>
    %116 = vector.extract_strided_slice %112 {offsets = [0, 1, 0, 0], sizes = [1, 1, 8, 8], strides = [1, 1, 1, 1]} : vector<1x4x8x8xbf16> to vector<1x1x8x8xbf16>
    %117 = vector.shape_cast %116 : vector<1x1x8x8xbf16> to vector<1x8x8xbf16>
    %118 = vector.shape_cast %117 : vector<1x8x8xbf16> to vector<8x8xbf16>
    %119 = vector.extract_strided_slice %112 {offsets = [0, 2, 0, 0], sizes = [1, 1, 8, 8], strides = [1, 1, 1, 1]} : vector<1x4x8x8xbf16> to vector<1x1x8x8xbf16>
    %120 = vector.shape_cast %119 : vector<1x1x8x8xbf16> to vector<1x8x8xbf16>
    %121 = vector.shape_cast %120 : vector<1x8x8xbf16> to vector<8x8xbf16>
    %122 = vector.extract_strided_slice %112 {offsets = [0, 3, 0, 0], sizes = [1, 1, 8, 8], strides = [1, 1, 1, 1]} : vector<1x4x8x8xbf16> to vector<1x1x8x8xbf16>
    %123 = vector.shape_cast %122 : vector<1x1x8x8xbf16> to vector<1x8x8xbf16>
    %124 = vector.shape_cast %123 : vector<1x8x8xbf16> to vector<8x8xbf16>
    %125 = tpu.concatenate %115, %118, %121, %124 in 1 : vector<8x8xbf16>, vector<8x8xbf16>, vector<8x8xbf16>, vector<8x8xbf16> -> vector<8x32xbf16>
    %c0_37 = arith.constant 0 : index
    %c0_38 = arith.constant 0 : index
    %126 = vector.load %arg5[%c0_37, %c0_38] : memref<32x32xbf16, #tpu.memory_space<vmem>>, vector<32x32xbf16>
    %cst_39 = arith.constant dense<0.000000e+00> : vector<8x32xf32>
    %127 = tpu.matmul %125, %126, %cst_39 {dimension_numbers = #tpu.dot_dimension_numbers<[1], [0], [0], [1], [0, 0, 1, 1], [], []>} : vector<8x32xbf16>, vector<32x32xbf16>, vector<8x32xf32> -> vector<8x32xf32>
    %c0_40 = arith.constant 0 : index
    %c0_41 = arith.constant 0 : index
    %128 = vector.load %arg6[%c0_40, %c0_41] : memref<1x32xf32, #tpu.memory_space<vmem>>, vector<1x32xf32>
    %129 = vector.broadcast %128 : vector<1x32xf32> to vector<8x32xf32>
    %130 = arith.addf %127, %129 : vector<8x32xf32>
    %131 = arith.mulf %130, %25 : vector<8x32xf32>
    %132 = vector.shape_cast %131 : vector<8x32xf32> to vector<1x8x32xf32>
    %c0_42 = arith.constant 0 : index
    %c0_43 = arith.constant 0 : index
    %c0_44 = arith.constant 0 : index
    %133 = vector.load %arg13[%c0_42, %c0_43, %c0_44] : memref<1x8x32xf32, #tpu.memory_space<vmem>>, vector<1x8x32xf32>
    tpu.vector_store %arg13[%c0_42, %c0_43, %c0_44], %132 {strides = array<i32>} : memref<1x8x32xf32, #tpu.memory_space<vmem>>, vector<1x8x32xf32>,
    return
  }
  func.func @transform_0(%arg0: i32, %arg1: i32) -> (i32, i32, i32) {
    %c0_i32 = arith.constant 0 : i32
    %c0_i32_0 = arith.constant 0 : i32
    return %arg0, %arg1, %c0_i32 : i32, i32, i32
  }
  func.func @transform_1(%arg0: i32, %arg1: i32) -> (i32, i32) {
    %c0_i32 = arith.constant 0 : i32
    %c0_i32_0 = arith.constant 0 : i32
    %c0_i32_1 = arith.constant 0 : i32
    return %c0_i32, %c0_i32_0 : i32, i32
  }
  func.func @transform_2(%arg0: i32, %arg1: i32) -> (i32, i32) {
    %c0_i32 = arith.constant 0 : i32
    %c0_i32_0 = arith.constant 0 : i32
    %c0_i32_1 = arith.constant 0 : i32
    return %c0_i32, %c0_i32_0 : i32, i32
  }
  func.func @transform_3(%arg0: i32, %arg1: i32) -> (i32, i32) {
    %c0_i32 = arith.constant 0 : i32
    %c0_i32_0 = arith.constant 0 : i32
    %c0_i32_1 = arith.constant 0 : i32
    return %c0_i32, %c0_i32_0 : i32, i32
  }
  func.func @transform_4(%arg0: i32, %arg1: i32) -> (i32, i32) {
    %c0_i32 = arith.constant 0 : i32
    %c0_i32_0 = arith.constant 0 : i32
    %c0_i32_1 = arith.constant 0 : i32
    return %c0_i32, %c0_i32_0 : i32, i32
  }
  func.func @transform_5(%arg0: i32, %arg1: i32) -> (i32, i32) {
    %c0_i32 = arith.constant 0 : i32
    %c0_i32_0 = arith.constant 0 : i32
    %c0_i32_1 = arith.constant 0 : i32
    return %c0_i32, %c0_i32_0 : i32, i32
  }
  func.func @transform_6(%arg0: i32, %arg1: i32) -> (i32, i32, i32) {
    %c0_i32 = arith.constant 0 : i32
    %c0_i32_0 = arith.constant 0 : i32
    %c0_i32_1 = arith.constant 0 : i32
    %c0_i32_2 = arith.constant 0 : i32
    return %c0_i32, %c0_i32_0, %c0_i32_1 : i32, i32, i32
  }
  func.func @transform_7(%arg0: i32, %arg1: i32) -> (i32, i32, i32) {
    %c0_i32 = arith.constant 0 : i32
    %c0_i32_0 = arith.constant 0 : i32
    %c0_i32_1 = arith.constant 0 : i32
    %c0_i32_2 = arith.constant 0 : i32
    return %c0_i32, %c0_i32_0, %c0_i32_1 : i32, i32, i32
  }
  func.func @transform_8(%arg0: i32, %arg1: i32) -> (i32, i32) {
    %c0_i32 = arith.constant 0 : i32
    %c0_i32_0 = arith.constant 0 : i32
    %c0_i32_1 = arith.constant 0 : i32
    return %c0_i32, %c0_i32_0 : i32, i32
  }
  func.func @transform_9(%arg0: i32, %arg1: i32) -> (i32, i32) {
    %c0_i32 = arith.constant 0 : i32
    %c0_i32_0 = arith.constant 0 : i32
    %c0_i32_1 = arith.constant 0 : i32
    return %c0_i32, %c0_i32_0 : i32, i32
  }
  func.func @transform_10(%arg0: i32, %arg1: i32) -> (i32, i32, i32) {
    %c0_i32 = arith.constant 0 : i32
    %c0_i32_0 = arith.constant 0 : i32
    %c0_i32_1 = arith.constant 0 : i32
    return %arg0, %c0_i32, %c0_i32_0 : i32, i32, i32
  }
  func.func @transform_11(%arg0: i32, %arg1: i32) -> (i32, i32, i32) {
    %c0_i32 = arith.constant 0 : i32
    %c0_i32_0 = arith.constant 0 : i32
    return %arg0, %arg1, %c0_i32 : i32, i32, i32
  }
  func.func @transform_12(%arg0: i32, %arg1: i32) -> (i32, i32, i32) {
    %c0_i32 = arith.constant 0 : i32
    %c0_i32_0 = arith.constant 0 : i32
    %c0_i32_1 = arith.constant 0 : i32
    return %arg0, %c0_i32, %c0_i32_0 : i32, i32, i32
  }
}

</mosaic_0001>

<bundles_post_ra>
// kernel: tpu_custom_call.1
= control target key start
LH: loop header
LB: loop body
LE: loop exit
PB: predicated region body
PF: predicated region fallthrough
CT: control target
= control target key end

     0   :  { %s3596_s0 = inlined_call_operand.hbm [shape: bf16[2,16,32], index: 0, kind: input, shape index: {}]   ;;  %s3597_s1 = inlined_call_operand.hbm [shape: bf16[32,100], index: 1, kind: input, shape index: {}]   ;;  %s3598_s2 = inlined_call_operand.hbm [shape: f32[1,100], index: 2, kind: input, shape index: {}]   ;;  %s3599_s3 = inlined_call_operand.hbm [shape: bf16[32,32], index: 3, kind: input, shape index: {}]   ;;  %s3600_s4 = inlined_call_operand.hbm [shape: f32[1,32], index: 4, kind: input, shape index: {}]   ;;  %s3601_s5 = inlined_call_operand.hbm [shape: f32[1,4], index: 5, kind: input, shape index: {}]   ;;  %s3602_s6 = inlined_call_operand.hbm [shape: f32[4,1,8], index: 6, kind: input, shape index: {}]   ;;  %s3603_s7 = inlined_call_operand.hbm [shape: f32[4,1,8], index: 7, kind: input, shape index: {}]   ;;  %s3604_s8 = inlined_call_operand.hbm [shape: f32[8,8], index: 8, kind: input, shape index: {}]   ;;  %s3605_s9 = inlined_call_operand.hbm [shape: f32[8,8], index: 9, kind: input, shape index: {}]   ;;  %s3606_s10 = inlined_call_operand.hbm [shape: f32[8,1,8], index: 10, kind: input, shape index: {}]   ;;  %s3607_s11 = inlined_call_operand.hbm [shape: f32[2,16,32], index: 11, kind: output, shape index: {0}]   ;;  %s3608_s12 = inlined_call_operand.hbm [shape: f32[8,1,8], index: 12, kind: output, shape index: {1}]  }
   0x1   :  { %3643 = sst [smem:[#allocation45_spill]] %s3596_s0 }
   0x2   :  { %3644 = sst [smem:[#allocation46_spill]] %s3597_s1 }
   0x3   :  { %3645 = sst [smem:[#allocation47_spill]] %s3598_s2 }
   0x4   :  { %3646 = sst [smem:[#allocation48_spill]] %s3599_s3 }
   0x5   :  { %3647 = sst [smem:[#allocation49_spill]] %s3600_s4 }
   0x6   :  { %3648 = sst [smem:[#allocation50_spill]] %s3601_s5 }
   0x7   :  { %3649 = sst [smem:[#allocation51_spill]] %s3602_s6 }
   0x8   :  { %3650 = sst [smem:[#allocation52_spill]] %s3603_s7 }
   0x9   :  { %3651 = sst [smem:[#allocation53_spill]] %s3604_s8 }
   0xa   :  { %3652 = sst [smem:[#allocation54_spill]] %s3605_s9 }
   0xb   :  { %3653 = sst [smem:[#allocation55_spill]] %s3606_s10 }
   0xc   :  { %3654 = sst [smem:[#allocation56_spill]] %s3607_s11 }
   0xd   :  { %3655 = sst [smem:[#allocation57_spill]] %s3608_s12 }
   0xe   :  { %18 = vsyncpa [#allocation4], 0 }
   0xf   :  { %20 = vsyncpa [#allocation4 + $0x1], 0 }
  0x10   :  { %21 = vsyncpa [#allocation7], 0 }
  0x11   :  { %22 = vsyncpa [#allocation10], 0 }
  0x12   :  { %23 = vsyncpa [#allocation13], 0 }
  0x13   :  { %24 = vsyncpa [#allocation16], 0 }
  0x14   :  { %25 = vsyncpa [#allocation19], 0 }
  0x15   :  { %26 = vsyncpa [#allocation5], 0 }
  0x16   :  { %28 = vsyncpa [#allocation5 + $0x1], 0 }
  0x17   :  { %29 = vsyncpa [#allocation23], 0 }
  0x18   :  { %31 = vsyncpa [#allocation23 + $0x1], 0  ;;  %s2883_s21 = smov 0   ;;  %s2885_s22 = smov 0  }
  0x19   :  { %s2887_s23 = smov 0   ;;  %s2889_s24 = smov 0  }
  0x1a   :  { %s2891_s25 = smov 0   ;;  %s2893_s26 = smov 0  }
  0x1b   :  { %s2895_s27 = smov 0   ;;  %s2897_s28 = smov 0  }
  0x1c   :  { %s2899_s29 = smov 0   ;;  %s2901_s30 = smov 0  }
  0x1d   :  { %s2903_s13 = smov 0  }
  0x1e LB: > { %3656 = sst [smem:[#allocation33_spill]] %s2745_s21  ;;  %s2939_s14 = sadd.s32 4294967295, %s2785_s13   ;;  %s2785_s13 = sphi %s2903_s13, %s37_s13   ;;  %s2781_s30 = sphi %s2901_s30, %s3740_s30   ;;  %s2777_s29 = sphi %s2899_s29, %s3732_s29   ;;  %s2773_s28 = sphi %s2897_s28, %s3739_s28   ;;  %s2769_s27 = sphi %s2895_s27, %s3731_s27   ;;  %s2765_s26 = sphi %s2893_s26, %s3730_s26   ;;  %s2761_s25 = sphi %s2891_s25, %s3738_s25   ;;  %s2757_s24 = sphi %s2889_s24, %s3737_s24   ;;  %s2753_s23 = sphi %s2887_s23, %s3736_s23   ;;  %s2749_s22 = sphi %s2885_s22, %s3735_s22   ;;  %s2745_s21 = sphi %s2883_s21, %s3734_s21  }
  0x1f   : > { %3657 = sst [smem:[#allocation34_spill]] %s2757_s24  ;;  %p1909_p0 = scmp.ge.s32.totalorder %s2785_s13, 1 }
  0x20   : > { %3658 = sst [smem:[#allocation35_spill]] %s2765_s26  ;;  %p3619_p1 = scmp.eq.s32.totalorder %s2939_s14, 0 }
  0x21   : > { %3659 = sst [smem:[#allocation36_spill]] %s2769_s27  ;;  %p351_p2 = scmp.lt.s32.totalorder %s2785_s13, 5 }
  0x22   : > { %3660 = sst [smem:[#allocation37_spill]] %s2773_s28  ;;  %s2787_s16 = smov [#allocation6]  }
  0x23   : > { %3661 = sst [smem:[#allocation38_spill]] %s2777_s29  ;;  %p2944_p3 = pnand %p1909_p0, %p351_p2 }
  0x24   : > { %s363_s17 = sshll.u32 %s2787_s16, 4  ;;  %s2788_s19 = smov [#allocation9]   ;;  %s2948_s17 = int_to_ptr.vmem [resolvable:$true] %s363_s17 }
  0x25   : > { %s3662_s15 = scalar_select %p2944_p3, 1, 0 }
  0x26   : > { %p2080_p4 = pneg %p2944_p3  ;;  %s387_s20 = sshll.u32 %s2788_s19, 4  ;;  %s2958_s20 = int_to_ptr.vmem [resolvable:$true] %s387_s20 }
  0x27   : > { %3663 = sst [smem:[#allocation39_spill]] %s3662_s15  ;;  %s2789_s11 = smov [#allocation12]  }
  0x28   : > { %p2954_p5 = pnand %p2080_p4, %p3619_p1  ;;  %s2960_s12 = sshll.u32 %s2789_s11, 4  ;;  %s413_s12 = int_to_ptr.vmem [resolvable:$true] %s2960_s12 }
  0x29   : > { %s3665_s1 = sld [smem:[#allocation46_spill]] }
  0x2a   : > { %s3664_s18 = scalar_select %p2954_p5, 1, 0 }
  0x2b   : > { %p2970_p7 = pneg %p2954_p5 }
  0x2f   : > { %s2295_s16 = scalar_lea.hbm %s3665_s1, 256 }
  0x30   : > { %p2296_p6 = scmp.ne.s32.totalorder %s3665_s1, %s2295_s16  ;;  %p2302_p10 = scmp.lt.u32.totalorder %s2295_s16, %s3665_s1 }
  0x32   : > { %p2298_p8 = pnand %p2970_p7, %p2296_p6 }
  0x34   : > { %p2299_p9 = pneg %p2298_p8 }
  0x36   : > { %p2304_p11 = pnand %p2302_p10, %p2299_p9 }
  0x38   : > { %2307 = shalt.err (!%p2304_p11)
}
  0x39   : > { %s2308_s10 = scalar_lea.vmem %s2948_s17, 256  ;;  %p2316_p2 = scmp.lt.s32.totalorder %s2948_s17, %s2948_s17 }
  0x3a   : > { %p2309_p12 = scmp.ne.s32.totalorder %s2948_s17, %s2308_s10  ;;  %p2317_p4 = scmp.lt.s32.totalorder %s2308_s10, %s2308_s10 }
  0x3c   : > { %p2311_p13 = pnand %p2309_p12, %p2970_p7  ;;  %p2318_p6 = por %p2317_p4, %p2316_p2 }
  0x3e   : > { %p2312_p0 = pneg %p2311_p13 }
  0x40   : > { %p2319_p8 = pnand %p2318_p6, %p2312_p0 }
  0x42   : > { %2322 = shalt.err (!%p2319_p8)
}
  0x43   : > { %s2790_s27 = smov 64   ;;  %s2791_s28 = smov 4  }
  0x44   : > { %2083 = dma.hbm_to_vmem [thread:$0]  (!%p2954_p5), %s3665_s1, 256, %s2948_s17, [#allocation7], %s2790_s27, %s2790_s27, %s2791_s28  }
  0x45   : > { %s3667_s3 = sld [smem:[#allocation48_spill]] }
  0x4b   : > { %s2323_s8 = scalar_lea.hbm %s3667_s3, 256 }
  0x4c   : > { %p2324_p9 = scmp.ne.s32.totalorder %s3667_s3, %s2323_s8  ;;  %p2330_p12 = scmp.lt.u32.totalorder %s2323_s8, %s3667_s3 }
  0x4e   : > { %p2326_p10 = pnand %p2324_p9, %p2970_p7 }
  0x50   : > { %p2327_p11 = pneg %p2326_p10 }
  0x52   : > { %p2332_p13 = pnand %p2330_p12, %p2327_p11 }
  0x54   : > { %2335 = shalt.err (!%p2332_p13)
}
  0x55   : > { %s2336_s17 = scalar_lea.vmem %s2958_s20, 256  ;;  %p2344_p6 = scmp.lt.s32.totalorder %s2958_s20, %s2958_s20 }
  0x56   : > { %p2337_p0 = scmp.ne.s32.totalorder %s2958_s20, %s2336_s17  ;;  %p2345_p8 = scmp.lt.s32.totalorder %s2336_s17, %s2336_s17 }
  0x58   : > { %p2339_p2 = pnand %p2337_p0, %p2970_p7  ;;  %p2346_p9 = por %p2345_p8, %p2344_p6 }
  0x5a   : > { %p2340_p4 = pneg %p2339_p2 }
  0x5c   : > { %p2347_p10 = pnand %p2346_p9, %p2340_p4 }
  0x5e   : > { %2350 = shalt.err (!%p2347_p10)
}
  0x5f   : > { %2089 = dma.hbm_to_vmem [thread:$0]  (!%p2954_p5), %s3667_s3, 256, %s2958_s20, [#allocation10], %s2790_s27, %s2790_s27, %s2791_s28  }
  0x60   : > { %s3668_s5 = sld [smem:[#allocation50_spill]] }
  0x66   : > { %s2351_s15 = scalar_lea.hbm %s3668_s5, 16 }
  0x67   : > { %p2352_p11 = scmp.ne.s32.totalorder %s3668_s5, %s2351_s15  ;;  %p2358_p0 = scmp.lt.u32.totalorder %s2351_s15, %s3668_s5 }
  0x69   : > { %p2354_p12 = pnand %p2352_p11, %p2970_p7 }
  0x6b   : > { %p2355_p13 = pneg %p2354_p12 }
  0x6d   : > { %p2360_p2 = pnand %p2358_p0, %p2355_p13 }
  0x6f   : > { %2363 = shalt.err (!%p2360_p2)
}
  0x70   : > { %s2364_s17 = scalar_lea.vmem %s413_s12, 16  ;;  %s2371_s20 = scalar_lea.vmem %s413_s12, 32 }
  0x71   : > { %p2365_p4 = scmp.ne.s32.totalorder %s413_s12, %s2364_s17  ;;  %p2372_p9 = scmp.lt.s32.totalorder %s413_s12, %s413_s12 }
  0x72   : > { %p2373_p10 = scmp.lt.s32.totalorder %s2371_s20, %s2364_s17 }
  0x73   : > { %p2367_p6 = pnand %p2365_p4, %p2970_p7 }
  0x74   : > { %p2374_p1 = por %p2373_p10, %p2372_p9 }
  0x75   : > { %p2368_p8 = pneg %p2367_p6 }
  0x77   : > { %p2375_p3 = pnand %p2374_p1, %p2368_p8 }
  0x79   : > { %2378 = shalt.err (!%p2375_p3)
}
  0x7a   : > { %2095 = dma.hbm_to_vmem [thread:$0]  (!%p2954_p5), %s3668_s5, 16, %s413_s12, [#allocation13]  }
  0x7b   : > { %s2792_s2 = smov [#allocation15]   ;;  %s3669_s7 = sld [smem:[#allocation52_spill]] }
  0x7c   : > { %s435_s4 = sshll.u32 %s2792_s2, 4  ;;  %s436_s4 = int_to_ptr.vmem [resolvable:$true] %s435_s4 }
  0x81   : > { %s2379_s15 = scalar_lea.hbm %s3669_s7, 64 }
  0x82   : > { %p2380_p11 = scmp.ne.s32.totalorder %s3669_s7, %s2379_s15  ;;  %p2386_p12 = scmp.lt.u32.totalorder %s2379_s15, %s3669_s7 }
  0x84   : > { %p2382_p1 = pnand %p2380_p11, %p2970_p7 }
  0x86   : > { %p2383_p3 = pneg %p2382_p1 }
  0x88   : > { %p2388_p13 = pnand %p2386_p12, %p2383_p3 }
  0x8a   : > { %2391 = shalt.err (!%p2388_p13)
}
  0x8b   : > { %s2392_s12 = scalar_lea.vmem %s436_s4, 64  ;;  %p2400_p6 = scmp.lt.s32.totalorder %s436_s4, %s436_s4 }
  0x8c   : > { %p2393_p0 = scmp.ne.s32.totalorder %s436_s4, %s2392_s12  ;;  %p2401_p8 = scmp.lt.s32.totalorder %s2392_s12, %s2392_s12 }
  0x8e   : > { %p2395_p2 = pnand %p2393_p0, %p2970_p7  ;;  %p2402_p9 = por %p2401_p8, %p2400_p6 }
  0x90   : > { %p2396_p4 = pneg %p2395_p2 }
  0x92   : > { %p2403_p10 = pnand %p2402_p9, %p2396_p4 }
  0x94   : > { %2406 = shalt.err (!%p2403_p10)
}
  0x95   : > { %s3621_s17 = smov 16   ;;  %s3623_s20 = smov 1  }
  0x96   : > { %2101 = dma.hbm_to_vmem [thread:$0]  (!%p2954_p5), %s3669_s7, 64, %s436_s4, [#allocation16], %s3621_s17, %s3621_s17, %s3623_s20  }
  0x97   : > { %s1908_s2 = sadd.s32 4294967294, %s2785_s13   ;;  %s46_s6 = sadd.s32 1, %s2777_s29 }
  0x98   : > { %p47_p11 = scmp.ge.s32.totalorder %s46_s6, 2  ;;  %s49_s8 = sadd.s32 1, %s2781_s30 }
  0x99   : > { %s58_s15 = sadd.s32 1, %s2765_s26  ;;  %p3626_p1 = scmp.ne.s32.totalorder %s2765_s26, %s2761_s25 }
  0x9a   : > { %s3742_s6 = smov (%p47_p11, %s46_s6), 0  ;;  %s3744_s8 = smov (!%p47_p11, %s49_s8), %s2781_s30 }
  0x9b   : > { %3670 = sst [smem:[#allocation40_spill]] %s3742_s6  ;;  %s54_s4 = ssub.s32 %s2777_s29, %s3742_s6 }
  0x9c   : > { %p66_p3 = scmp.eq.s32.totalorder %s2785_s13, 0  ;;  %p51_p12 = scmp.ge.s32.totalorder %s3744_s8, 2 }
  0x9d   : > { %p3625_p13 = scmp.ne.s32.totalorder %s2761_s25, %s2757_s24  ;;  %s273_s19 = sadd.s32 1, %s2753_s23 }
  0x9e   : > { %p3073_p0 = por %p66_p3, %p3626_p1  ;;  %s3746_s8 = smov (%p51_p12, %s3744_s8), 0 }
  0x9f   : > { %3672 = sst [smem:[#allocation41_spill]] %s3746_s8  ;;  %p3673_p2 = scmp.eq.s32.totalorder %s2939_s14, 0 }
  0xa0   : > { %p280_p6 = scmp.ne.s32.totalorder %s2753_s23, %s2749_s22  ;;  %s53_s10 = ssub.s32 %s2781_s30, %s3746_s8 }
  0xa1   : > { %p3085_p4 = por %p3673_p2, %p3625_p13  ;;  %p286_p8 = scmp.ne.s32.totalorder %s2749_s22, %s2745_s21 }
  0xa2   : > { %s55_s12 = sor.u32 %s54_s4, %s53_s10  ;;  %p271_p9 = scmp.eq.s32.totalorder %s53_s10, 0 }
  0xa3   : > { %s3674_s11 = scalar_select %p3085_p4, 1, 0 }
  0xa4   : > { %p56_p10 = scmp.eq.s32.totalorder %s55_s12, 0  ;;  %p3100_p11 = por %p280_p6, %p66_p3 }
  0xa5   : > { %s3105_s28 = scalar_select %p271_p9, %s2753_s23, %s273_s19  }
  0xa6   : > { %s3108_s17 = scalar_select %p56_p10, %s2765_s26, %s58_s15  }
  0xa7   : > { %3676 = sst [smem:[#allocation42_spill]] %s3105_s28  ;;  %p3678_p12 = pmov %p3673_p2 }
  0xa8   : > { %3677 = sst [smem:[#allocation43_spill]] %s3108_s17  ;;  %p312_p13 = scmp.eq.s32.totalorder %s2939_s14, 3 }
  0xa9   : > { %p3115_p2 = por %p286_p8, %p3678_p12  ;;  %p318_p1 = scmp.eq.s32.totalorder %s1908_s2, 3 }
  0xaa   : > { %p2131_p4 = scmp.lt.s32.totalorder %s2785_s13, 4  ;;  %p3680_p5 = scmp.ne.s32.totalorder %s2765_s26, %s2761_s25 }
  0xab   : > { %s3679_s20 = scalar_select %p3115_p2, 1, 0 }
  0xac   : > { %p3124_p3 = por %p312_p13, %p3680_p5  ;;  %p3131_p9 = por %p312_p13, %p280_p6 }
  0xad   : > { %p3683_p10 = scmp.ne.s32.totalorder %s2761_s25, %s2757_s24  ;;  %p3145_p2 = por %p318_p1, %p286_p8 }
  0xae   : > { %s3681_s4 = scalar_select %p3124_p3, 1, 0 }
  0xaf   : > { %s3682_s15 = scalar_select %p3131_p9, 1, 0 }
  0xb0   : > { %p3138_p12 = por %p318_p1, %p3683_p10  ;;  %s471_s10 = sand.u32 1, %s2785_s13  }
  0xb1   : > { %s3685_s2 = scalar_select %p3145_p2, 1, 0 }
  0xb2   : > { %s3684_s19 = scalar_select %p3138_p12, 1, 0 }
  0xb3   : > { %3686 = sst [smem:[#allocation44_spill]] %s3685_s2  ;;  %s473_s12 = sand.u32 1, %s2765_s26  }
  0xb4   : > { %s1920_s1 = sshll.u32 %s473_s12, 2  ;;  %s1921_s3 = sshll.u32 %s2781_s30, 1 }
  0xb5   : > { %s480_s5 = sadd.s32 %s2777_s29, %s1921_s3  ;;  %s475_s7 = scalar_lea.vmem [#allocation3], %s1920_s1 }
  0xb6   : > { %s484_s8 = sshll.u32 %s475_s7, 4  ;;  %s1922_s6 = sshll.u32 %s480_s5, 6  ;;  %s3153_s8 = int_to_ptr.vmem [resolvable:$true] %s484_s8 }
  0xb7   : > { %s3687_s0 = sld [smem:[#allocation45_spill]]  ;;  %p3164_p5 = pnand %p2131_p4, %p3073_p0 }
  0xb8   : > { %p3172_p1 = pnand %p2131_p4, %p3100_p11  ;;  %s2795_s3 = smov [#allocation8]  }
  0xb9   : > { %s3176_s5 = sshll.u32 %s2795_s3, 4  ;;  %s3178_s7 = scalar_lea.sflag [#allocation4], %s471_s10  ;;  %s378_s5 = int_to_ptr.vmem [resolvable:$true] %s3176_s5 }
  0xba   : > { %s3689_s1 = scalar_select %p3172_p1, 1, 0 }
  0xbb   : > { %p2409_p0 = pneg %p3164_p5 }
  0xbd   : > { %s3158_s24 = scalar_lea.hbm %s3687_s0, %s1922_s6  ;;  %s2412_s27 = scalar_lea.hbm %s3687_s0, 256 }
  0xbe   : > { %s2407_s17 = scalar_lea.hbm %s3158_s24, 64  ;;  %p2413_p4 = scmp.lt.u32.totalorder %s3158_s24, %s3687_s0 }
  0xbf   : > { %p2408_p13 = scmp.ne.s32.totalorder %s3158_s24, %s2407_s17  ;;  %p2414_p11 = scmp.lt.u32.totalorder %s2412_s27, %s2407_s17 }
  0xc0   : > { %p2416_p2 = scmp.lt.u32.totalorder %s2407_s17, %s3158_s24 }
  0xc1   : > { %p2410_p6 = pnand %p2409_p0, %p2408_p13  ;;  %p2415_p10 = por %p2414_p11, %p2413_p4 }
  0xc3   : > { %p2411_p8 = pneg %p2410_p6  ;;  %p2417_p12 = por %p2416_p2, %p2415_p10 }
  0xc5   : > { %p2418_p3 = pnand %p2417_p12, %p2411_p8 }
  0xc7   : > { %2421 = shalt.err (!%p2418_p3)
}
  0xc8   : > { %s2422_s10 = scalar_lea.vmem %s3153_s8, 64  ;;  %s2796_s3 = smov [#allocation3]  }
  0xc9   : > { %p2423_p13 = scmp.ne.s32.totalorder %s3153_s8, %s2422_s10  ;;  %s2427_s6 = sshll.u32 %s2796_s3, 4  ;;  %s2428_s6 = int_to_ptr.vmem [resolvable:$false] %s2427_s6 }
  0xca   : > { %s2429_s29 = scalar_lea.vmem %s2428_s6, 128  ;;  %p2430_p1 = scmp.lt.s32.totalorder %s3153_s8, %s2428_s6 }
  0xcb   : > { %p2425_p6 = pnand %p2423_p13, %p2409_p0  ;;  %p2431_p4 = scmp.lt.s32.totalorder %s2429_s29, %s2422_s10 }
  0xcd   : > { %p2426_p9 = pneg %p2425_p6  ;;  %p2432_p11 = por %p2431_p4, %p2430_p1 }
  0xcf   : > { %p2433_p2 = pnand %p2432_p11, %p2426_p9 }
  0xd1   : > { %2436 = shalt.err (!%p2433_p2)
}
  0xd2   : > { %2111 = dma.hbm_to_vmem [thread:$0]  (!%p3164_p5), %s3158_s24, 64, %s3153_s8, %s3178_s7  }
  0xd3   : > { %s3690_s27 = sld [smem:[#allocation47_spill]] }
  0xd9   : > { %s3691_s0 = smov %s3690_s27  ;;  %s2437_s28 = scalar_lea.hbm %s3690_s27, 16 }
  0xda   : > { %p2438_p3 = scmp.ne.s32.totalorder %s3691_s0, %s2437_s28  ;;  %p2444_p1 = scmp.lt.u32.totalorder %s2437_s28, %s3691_s0 }
  0xdc   : > { %p2440_p9 = pnand %p2438_p3, %p2970_p7 }
  0xde   : > { %p2441_p12 = pneg %p2440_p9 }
  0xe0   : > { %p2446_p0 = pnand %p2444_p1, %p2441_p12 }
  0xe2   : > { %2449 = shalt.err (!%p2446_p0)
}
  0xe3   : > { %s2450_s6 = scalar_lea.vmem %s378_s5, 16  ;;  %s2457_s24 = scalar_lea.vmem %s378_s5, 32 }
  0xe4   : > { %p2451_p5 = scmp.ne.s32.totalorder %s378_s5, %s2450_s6  ;;  %p2458_p13 = scmp.lt.s32.totalorder %s378_s5, %s378_s5 }
  0xe5   : > { %p2459_p6 = scmp.lt.s32.totalorder %s2457_s24, %s2450_s6 }
  0xe6   : > { %p2453_p8 = pnand %p2451_p5, %p2970_p7 }
  0xe7   : > { %p2460_p4 = por %p2459_p6, %p2458_p13 }
  0xe8   : > { %p2454_p10 = pneg %p2453_p8 }
  0xea   : > { %p2461_p11 = pnand %p2460_p4, %p2454_p10 }
  0xec   : > { %2464 = shalt.err (!%p2461_p11)
}
  0xed   : > { %p3692_p2 = scmp.ne.s32.totalorder %s3664_s18, 0  ;;  %s2797_s29 = smov [#allocation11]  }
  0xee   : > { %s401_s17 = sshll.u32 %s2797_s29, 4  ;;  %s2798_s16 = smov [#allocation14]   ;;  %s402_s17 = int_to_ptr.vmem [resolvable:$true] %s401_s17 }
  0xef   : > { %2086 = dma.hbm_to_vmem [thread:$0]  (!%p3692_p2), %s3691_s0, 16, %s378_s5, [#allocation7]  }
  0xf0   : > { %s422_s27 = sshll.u32 %s2798_s16, 4  ;;  %s3693_s10 = sld [smem:[#allocation49_spill]]  ;;  %s3225_s27 = int_to_ptr.vmem [resolvable:$true] %s422_s27 }
  0xf6   : > { %s2465_s12 = scalar_lea.hbm %s3693_s10, 16 }
  0xf7   : > { %p2466_p3 = scmp.ne.s32.totalorder %s3693_s10, %s2465_s12  ;;  %p2472_p1 = scmp.lt.u32.totalorder %s2465_s12, %s3693_s10 }
  0xf9   : > { %p2468_p9 = pnand %p2466_p3, %p2970_p7 }
  0xfb   : > { %p2469_p12 = pneg %p2468_p9 }
  0xfd   : > { %p2474_p0 = pnand %p2472_p1, %p2469_p12 }
  0xff   : > { %2477 = shalt.err (!%p2474_p0)
}
 0x100   : > { %s2478_s8 = scalar_lea.vmem %s402_s17, 16  ;;  %s2485_s29 = scalar_lea.vmem %s402_s17, 32 }
 0x101   : > { %p2479_p5 = scmp.ne.s32.totalorder %s402_s17, %s2478_s8  ;;  %p2486_p13 = scmp.lt.s32.totalorder %s402_s17, %s402_s17 }
 0x102   : > { %p2487_p6 = scmp.lt.s32.totalorder %s2485_s29, %s2478_s8 }
 0x103   : > { %p2481_p8 = pnand %p2479_p5, %p2970_p7 }
 0x104   : > { %p2488_p4 = por %p2487_p6, %p2486_p13 }
 0x105   : > { %p2482_p10 = pneg %p2481_p8 }
 0x107   : > { %p2489_p11 = pnand %p2488_p4, %p2482_p10 }
 0x109   : > { %2492 = shalt.err (!%p2489_p11)
}
 0x10a   : > { %2092 = dma.hbm_to_vmem [thread:$0]  (!%p3692_p2), %s3693_s10, 16, %s402_s17, [#allocation10]  }
 0x10b   : > { %s3694_s6 = sld [smem:[#allocation51_spill]] }
 0x111   : > { %s2493_s24 = scalar_lea.hbm %s3694_s6, 64 }
 0x112   : > { %p2494_p3 = scmp.ne.s32.totalorder %s3694_s6, %s2493_s24  ;;  %p2500_p1 = scmp.lt.u32.totalorder %s2493_s24, %s3694_s6 }
 0x114   : > { %p2496_p9 = pnand %p2494_p3, %p2970_p7 }
 0x116   : > { %p2497_p12 = pneg %p2496_p9 }
 0x118   : > { %p2502_p0 = pnand %p2500_p1, %p2497_p12 }
 0x11a   : > { %2505 = shalt.err (!%p2502_p0)
}
 0x11b   : > { %s2506_s17 = scalar_lea.vmem %s3225_s27, 64  ;;  %p2514_p13 = scmp.lt.s32.totalorder %s3225_s27, %s3225_s27 }
 0x11c   : > { %p2507_p5 = scmp.ne.s32.totalorder %s3225_s27, %s2506_s17  ;;  %p2515_p6 = scmp.lt.s32.totalorder %s2506_s17, %s2506_s17 }
 0x11e   : > { %p2509_p8 = pnand %p2507_p5, %p2970_p7  ;;  %p2516_p4 = por %p2515_p6, %p2514_p13 }
 0x120   : > { %p2510_p10 = pneg %p2509_p8 }
 0x122   : > { %p2517_p11 = pnand %p2516_p4, %p2510_p10 }
 0x124   : > { %2520 = shalt.err (!%p2517_p11)
}
 0x125   : > { %s3695_s16 = smov 1   ;;  %s3696_s28 = smov 16  }
 0x126   : > { %2098 = dma.hbm_to_vmem [thread:$0]  (!%p3692_p2), %s3694_s6, 64, %s3225_s27, [#allocation13], %s3696_s28, %s3696_s28, %s3695_s16  }
 0x127   : > { %s2799_s24 = smov [#allocation17]   ;;  %s2800_s5 = smov [#allocation18]  }
 0x128   : > { %s449_s26 = sshll.u32 %s2799_s24, 4  ;;  %s460_s8 = sshll.u32 %s2800_s5, 4  ;;  %s450_s26 = int_to_ptr.vmem [resolvable:$true] %s449_s26  ;;  %s3271_s8 = int_to_ptr.vmem [resolvable:$true] %s460_s8 }
 0x129   : > { %s3697_s0 = sld [smem:[#allocation53_spill]] }
 0x12f   : > { %s2521_s10 = scalar_lea.hbm %s3697_s0, 128 }
 0x130   : > { %p2522_p3 = scmp.ne.s32.totalorder %s3697_s0, %s2521_s10  ;;  %p2528_p1 = scmp.lt.u32.totalorder %s2521_s10, %s3697_s0 }
 0x132   : > { %p2524_p9 = pnand %p2522_p3, %p2970_p7 }
 0x134   : > { %p2525_p12 = pneg %p2524_p9 }
 0x136   : > { %p2530_p0 = pnand %p2528_p1, %p2525_p12 }
 0x138   : > { %2533 = shalt.err (!%p2530_p0)
}
 0x139   : > { %s2534_s12 = scalar_lea.vmem %s450_s26, 128  ;;  %p2542_p13 = scmp.lt.s32.totalorder %s450_s26, %s450_s26 }
 0x13a   : > { %p2535_p5 = scmp.ne.s32.totalorder %s450_s26, %s2534_s12  ;;  %p2543_p6 = scmp.lt.s32.totalorder %s2534_s12, %s2534_s12 }
 0x13c   : > { %p2537_p8 = pnand %p2535_p5, %p2970_p7  ;;  %p2544_p4 = por %p2543_p6, %p2542_p13 }
 0x13e   : > { %p2538_p10 = pneg %p2537_p8 }
 0x140   : > { %p2545_p11 = pnand %p2544_p4, %p2538_p10 }
 0x142   : > { %2548 = shalt.err (!%p2545_p11)
}
 0x143   : > { %2104 = dma.hbm_to_vmem [thread:$0]  (!%p3692_p2), %s3697_s0, 128, %s450_s26, [#allocation16]  }
 0x144   : > { %s3698_s5 = sld [smem:[#allocation54_spill]] }
 0x14a   : > { %s2549_s29 = scalar_lea.hbm %s3698_s5, 128 }
 0x14b   : > { %p2550_p3 = scmp.ne.s32.totalorder %s3698_s5, %s2549_s29  ;;  %p2556_p1 = scmp.lt.u32.totalorder %s2549_s29, %s3698_s5 }
 0x14d   : > { %p2552_p9 = pnand %p2550_p3, %p2970_p7 }
 0x14f   : > { %p2553_p12 = pneg %p2552_p9 }
 0x151   : > { %p2558_p0 = pnand %p2556_p1, %p2553_p12 }
 0x153   : > { %2561 = shalt.err (!%p2558_p0)
}
 0x154   : > { %s2562_s26 = scalar_lea.vmem %s3271_s8, 128  ;;  %p2570_p13 = scmp.lt.s32.totalorder %s3271_s8, %s3271_s8 }
 0x155   : > { %p2563_p5 = scmp.ne.s32.totalorder %s3271_s8, %s2562_s26  ;;  %p2571_p6 = scmp.lt.s32.totalorder %s2562_s26, %s2562_s26 }
 0x157   : > { %p2565_p8 = pnand %p2563_p5, %p2970_p7  ;;  %p2572_p4 = por %p2571_p6, %p2570_p13 }
 0x159   : > { %p2566_p10 = pneg %p2565_p8 }
 0x15b   : > { %p2573_p11 = pnand %p2572_p4, %p2566_p10 }
 0x15d   : > { %2576 = shalt.err (!%p2573_p11)
}
 0x15e   : > { %2107 = dma.hbm_to_vmem [thread:$0]  (!%p3692_p2), %s3698_s5, 128, %s3271_s8, [#allocation19]  }
 0x15f   : > { %s493_s9 = sand.u32 1, %s2753_s23   ;;  %s1977_s10 = sshll.u32 %s2781_s30, 6 }
 0x160   : > { %s1923_s24 = sshll.u32 %s493_s9, 2  ;;  %s3699_s3 = sld [smem:[#allocation55_spill]] }
 0x161   : > { %s495_s18 = scalar_lea.vmem [#allocation20], %s1923_s24  ;;  %p3700_p3 = scmp.ne.s32.totalorder %s3689_s1, 0 }
 0x162   : > { %s502_s12 = sshll.u32 %s495_s18, 4  ;;  %s3321_s12 = int_to_ptr.vmem [resolvable:$true] %s502_s12 }
 0x163   : > { %p2579_p2 = pneg %p3700_p3 }
 0x166   : > { %s3319_s27 = scalar_lea.hbm %s3699_s3, %s1977_s10  ;;  %s2582_s2 = scalar_lea.hbm %s3699_s3, 128 }
 0x167   : > { %s2577_s26 = scalar_lea.hbm %s3319_s27, 64  ;;  %p2583_p1 = scmp.lt.u32.totalorder %s3319_s27, %s3699_s3 }
 0x168   : > { %p2578_p7 = scmp.ne.s32.totalorder %s3319_s27, %s2577_s26  ;;  %p2584_p0 = scmp.lt.u32.totalorder %s2582_s2, %s2577_s26 }
 0x169   : > { %p2586_p8 = scmp.lt.u32.totalorder %s2577_s26, %s3319_s27 }
 0x16a   : > { %p2580_p9 = pnand %p2579_p2, %p2578_p7  ;;  %p2585_p5 = por %p2584_p0, %p2583_p1 }
 0x16c   : > { %p2581_p12 = pneg %p2580_p9  ;;  %p2587_p10 = por %p2586_p8, %p2585_p5 }
 0x16e   : > { %p2588_p13 = pnand %p2587_p10, %p2581_p12 }
 0x170   : > { %2591 = shalt.err (!%p2588_p13)
}
 0x171   : > { %s2592_s24 = scalar_lea.vmem %s3321_s12, 64  ;;  %s2801_s29 = smov [#allocation20]  }
 0x172   : > { %p2593_p6 = scmp.ne.s32.totalorder %s3321_s12, %s2592_s24  ;;  %s2597_s17 = sshll.u32 %s2801_s29, 4  ;;  %s2598_s17 = int_to_ptr.vmem [resolvable:$false] %s2597_s17 }
 0x173   : > { %s2599_s18 = scalar_lea.vmem %s2598_s17, 128  ;;  %p2600_p7 = scmp.lt.s32.totalorder %s3321_s12, %s2598_s17 }
 0x174   : > { %p2595_p4 = pnand %p2593_p6, %p2579_p2  ;;  %p2601_p9 = scmp.lt.s32.totalorder %s2599_s18, %s2592_s24 }
 0x176   : > { %p2596_p11 = pneg %p2595_p4  ;;  %p2602_p1 = por %p2601_p9, %p2600_p7 }
 0x178   : > { %p2603_p0 = pnand %p2602_p1, %p2596_p11 }
 0x17a   : > { %2606 = shalt.err (!%p2603_p0)
}
 0x17b   : > { %2114 = dma.hbm_to_vmem [thread:$0]  (!%p3700_p3), %s3319_s27, 64, %s3321_s12, %s3178_s7, %s3696_s28, %s3696_s28, %s3695_s16  }
 0x17c   : > { %s3701_s26 = sld [smem:[#allocation39_spill]] }
 0x182   : > { %p3702_p2 = scmp.ne.s32.totalorder %s3701_s26, 0 }
 0x183   : > { %s516_s8 = sand.u32 (!%p3702_p2), 1, %s2939_s14   ;;  %s3356_s21 = sand.u32 (!%p3702_p2), 1, %s2761_s25  }
 0x184   : > { %514 = sbr.rel (%p3702_p2) target bundleno = 2386 (0x952), region = 64  ;;  %s1927_s2 = sshll.u32 (!%p3702_p2), %s3356_s21, 2 }
 0x185   : > { %s517_s9 = scalar_lea.sflag (!%p3702_p2), [#allocation4], %s516_s8  ;;  %s3359_s1 = scalar_lea.vmem (!%p3702_p2), [#allocation3], %s1927_s2 }
 0x186   : > { %p3703_p12 = scmp.ne.s32.totalorder (!%p3702_p2), %s3674_s11, 0 }
 0x18b   : > { %2708 = dma.done.wait (%p3703_p12), %s517_s9, 64  }
 0x18c   : > { %2710 = vsyncadd (%p3703_p12), %s517_s9, 4294967232  ;;  %p3704_p3 = scmp.eq.s32.totalorder %s2939_s14, 0 }
 0x18e   : > { %2712 = dma.done.wait (%p3704_p3), [#allocation7], 272   ;;  %p3705_p5 = pmov %p3704_p3 }
 0x18f   : > { %p3706_p8 = pmov %p3704_p3 }
 0x190   : > { %2714 = vsyncadd (%p3705_p5), [#allocation7], 4294967024 }
 0x191   : > { %2716 = dma.done.wait (%p3706_p8), [#allocation10], 272   ;;  %p3707_p10 = pmov %p3704_p3 }
 0x192   : > { %p3708_p13 = pmov %p3704_p3 }
 0x193   : > { %2718 = vsyncadd (%p3707_p10), [#allocation10], 4294967024 }
 0x194   : > { %2720 = dma.done.wait (%p3708_p13), [#allocation13], 80   ;;  %p3709_p6 = pmov %p3704_p3 }
 0x195   : > { %p3710_p4 = pmov %p3704_p3 }
 0x196   : > { %2722 = vsyncadd (%p3709_p6), [#allocation13], 4294967216 }
 0x197   : > { %2724 = dma.done.wait (%p3710_p4), [#allocation16], 192   ;;  %p3711_p11 = pmov %p3704_p3 }
 0x198   : > { %p3712_p7 = pmov %p3704_p3 }
 0x199   : > { %2726 = vsyncadd (%p3711_p11), [#allocation16], 4294967104 }
 0x19a   : > { %2728 = dma.done.wait (%p3712_p7), [#allocation19], 128   ;;  %p3713_p9 = pmov %p3704_p3 }
 0x19b   : > { %s563_s11 = sand.u32 1, %s2749_s22   ;;  %p3714_p1 = scmp.ne.s32.totalorder %s3679_s20, 0 }
 0x19c   : > { %2730 = vsyncadd (%p3713_p9), [#allocation19], 4294967168  ;;  %s1937_s7 = sshll.u32 %s563_s11, 2 }
 0x19d   : > { %s565_s16 = scalar_lea.vmem [#allocation20], %s1937_s7 }
 0x19e   : > { %2732 = dma.done.wait (%p3714_p1), %s517_s9, 64  }
 0x19f   : > { %2734 = vsyncadd (%p3714_p1), %s517_s9, 4294967232  ;;  %s1938_s28 = sshll.u32 %s3356_s21, 3  ;;  %s3395_s12 = scalar_lea.vmem [#allocation22], %s1937_s7 }
 0x1a0   : > { %s3393_s27 = scalar_lea.vmem [#allocation21], %s1938_s28  ;;  %s3715_s14 = sld [smem:[#allocation36_spill]] }
 0x1a6   : > { %p1940_p0 = scmp.ne.s32.totalorder %s3715_s14, 0 }
 0x1a7   : > { %v623_v0 = vld [vmem:[%s565_s16] sm:$0x1] (!%p1940_p0)  ;;  %vm627_vm0 = vcmask (!%p1940_p0), 57344   ;;  %v624_v1 = vld [vmem:[%s565_s16 + $0x1] sm:$0x1] (!%p1940_p0) }
 0x1a8   : > { %622 = sbr.rel (%p1940_p0) target bundleno = 431 (0x1af), region = 112  ;;  %628 = vst.msk [vmem:[#allocation2] sm:$0x1] (!%p1940_p0), %vm627_vm0, %v623_v0  ;;  %629 = vst.msk [vmem:[#allocation2 + $0x1] sm:$0x1] (!%p1940_p0), %vm627_vm0, %v624_v1 }
 0x1a9   : > { %v625_v2 = vld [vmem:[%s565_s16 + $0x2] sm:$0x1] (!%p1940_p0)  ;;  %v626_v3 = vld [vmem:[%s565_s16 + $0x3] sm:$0x1] (!%p1940_p0) }
 0x1aa   : > { %630 = vst.msk [vmem:[#allocation2 + $0x2] sm:$0x1] (!%p1940_p0), %vm627_vm0, %v625_v2  ;;  %631 = vst.msk [vmem:[#allocation2 + $0x3] sm:$0x1] (!%p1940_p0), %vm627_vm0, %v626_v3 }
 0x1af PF: > { %v2259_v4 = vld [vmem:[#allocation6] sm:$0xff]   ;;  %v2802_v5 = vmov 0.0   ;;  %v2260_v6 = vld [vmem:[#allocation6 + $0x8] sm:$0xff]   ;;  %vm2803_vm1 = vmmov 0   ;;  %v632_v7 = vld [vmem:[%s3359_s1] sm:$0xf]  ;;  %v853_v36 = vlaneseq }
 0x1b0   : > { %1995 = vmatprep.subr.bf16.mxu0 %v2802_v5  ;;  %2008 = vmatprep.subr.mxu1 %v2802_v5  ;;  %vm656_vm2 = vcmask 261120   ;;  %v1941_v8 = vld [vmem:[#allocation8] ss:$0 sm:$0xff]  ;;  %s2804_s20 = smov 32   ;;  %v1946_v30 = vld [vmem:[#allocation12] ss:$0 sm:$0xff] }
 0x1b1   : > { %1996 = vmatpush3.bf16.msra.mxu0 %v2259_v4  ;;  %1999 = vmatprep.mubr.msk.bf16.mxu0 %vm2803_vm1, %v2802_v5  ;;  %v774_v20 = vld [vmem:[#allocation17] sm:$0xff]  ;;  %vm775_vm5 = vcmask 64512   ;;  %v2805_v34 = vmov 1966171168   ;;  %v854_v38 = vshrl.u32 %v853_v36, 7  ;;  %s2806_s10 = smov 96  }
 0x1b2   : > { %1997 = vmatprep.subr.bf16.mxu0 %v2802_v5  ;;  %2010 = vmatprep.mubr.msk.f32.mxu1 %vm2803_vm1, %v2802_v5  ;;  %v851_v35 = vunpack.c.l.s4 %v2805_v34  ;;  %v2807_v56 = vmov 0   ;;  %s2808_s24 = smov 120   ;;  %s2809_s29 = smov 112   ;;  %v1948_v34 = vld [vmem:[#allocation2] ss:$0 sm:$0xff]  ;;  %vm1425_vm6 = vcmask 64519  }
 0x1b3   : > { %v3422_v43 = vsub.s32 0, %v854_v38  ;;  %s2810_s17 = smov 104   ;;  %s3716_s18 = sld [smem:[#allocation36_spill]] }
 0x1b4   : > { %v852_v37 = vunpack.c.0.s8 %v851_v35 }
 0x1b5   : > { %1998 = vmatpush3.bf16.msra.mxu0 %v2260_v6 }
 0x1b6   : > { %2003 = vmatprep.subr.mxu0 %v2802_v5  ;;  %v855_v39 = vsub.s32 %v852_v37, %v854_v38 }
 0x1b8   : > { %2000 = vmatmul.mubr.msk.bf16.vlgmr.msra.gmra.mrb[0].mxu0 %vm656_vm2, %v632_v7 }
 0x1b9   : > { %2005 = vmatprep.mubr.msk.f32.mxu0 %vm2803_vm1, %v2802_v5  ;;  %2004 = vmatpush3.msra.mxu0 %v774_v20  ;;  %p1956_p2 = scmp.ne.s32.totalorder %s3716_s18, 1 }
 0x1ba   : > { %2023 = vmatprep.subr.mxu0 %v2802_v5 }
 0x28b   : > { %v694_v9 = vpop.f32.mrb[0].mxu0 }
 0x28c   : > { %v3410_v10 = vadd.f32 %v1941_v8, %v694_v9  ;;  %v2001_v11 = vpop.f32.mrb[1].mxu0  ;;  %v1050_v9 = vld [vmem:[#allocation18] sm:$0xff] }
 0x28d   : > { %v697_v12 = vpop.f32.mrb[2].mxu0 }
 0x28e   : > { %v716_v13 = vand.u32 2147483647, %v3410_v10  ;;  %v2002_v14 = vpop.f32.mrb[3].mxu0  ;;  %v713_v26 = vmax.f32 %v3410_v10, 0.0  ;;  %vm714_vm4 = vcmp.ne.f32.partialorder %v3410_v10, %v3410_v10  ;;  %v1945_v40 = vmul.f32 -1.442695, %v3410_v10 }
 0x290   : > { %v717_v15 = vsub.f32 0.0, %v716_v13 }
 0x292   : > { %v718_v16 = vmul.f32 1.442695, %v717_v15 }
 0x294   : > { %2261 = vpow2.f32 %v718_v16 }
 0x29e   : > { %v2262_v17 = vpop.eup %2261 }
 0x29f   : > { %v720_v18 = vadd.f32 1.0, %v2262_v17  ;;  %v723_v19 = vmul.f32 -0.5, %v2262_v17  ;;  %v726_v22 = vand.u32 2147483647, %v2262_v17 }
 0x2a1   : > { %2263 = vlog2.f32 %v720_v18  ;;  %v724_v21 = vadd.f32 1.0, %v723_v19  ;;  %vm727_vm3 = vcmp.lt.f32.partialorder %v726_v22, 0.0004427343 }
 0x2a2   : > { %2265 = vpow2.f32 %v1945_v40  ;;  %v1949_v40 = vld [vmem:[#allocation2 + $0x1] ss:$0 sm:$0xff] }
 0x2a3   : > { %v725_v25 = vmul.f32 %v2262_v17, %v724_v21 }
 0x2ab   : > { %v2264_v23 = vpop.eup %2263 }
 0x2ac   : > { %v722_v24 = vmul.f32 0.6931472, %v2264_v23  ;;  %v2266_v52 = vpop.eup %2265 }
 0x2ad   : > { %v703_v53 = vadd.f32 1.0, %v2266_v52 }
 0x2ae   : > { %v728_v27 = vsel %vm727_vm3, %v725_v25, %v722_v24 }
 0x2af   : > { %v729_v28 = vadd.f32 %v728_v27, %v713_v26  ;;  %2267 = vrcp.f32 %v703_v53 }
 0x2b1   : > { %v730_v29 = vsel %vm714_vm4, %v3410_v10, %v729_v28 }
 0x2b2   : > { %738 = vrot.lane.b32.xlu0 %v730_v29, %s2804_s20 }
 0x2b9   : > { %v2268_v54 = vpop.eup %2267 }
 0x2ba   : > { %v3438_v55 = vmul.f32 %v2268_v54, %v3410_v10 }
 0x324   : > { %v739_v31 = vpop.permute.xlu0 %738 }
 0x325   : > { %v741_v32 = vmul.f32 %v1946_v30, %v739_v31 }
 0x327   : > { %742 = vxpose.xlu0.b32.start.end [1/1] (short) (narrow) %v741_v32, 8 }
 0x3a7   : > { %v758_v33 = vpop.trf.xlu0 }
 0x3a8   : > { %2006 = vmatmul.mubr.msk.f32.vlgmr.msra.gmra.mrb[4].mxu0 %vm775_vm5, %v758_v33 }
 0x3a9   : > { %2025 = vmatprep.mubr.msk.f32.mxu0 %vm2803_vm1, %v2802_v5 }
 0x47b   : > { %v845_v41 = vpop.f32.mrb[4].mxu0 }
 0x47c   : > { %v856_v42 = vrot.slane %v845_v41, %v855_v39  ;;  %v2007_v44 = vpop.f32.mrb[5].mxu0 }
 0x47e   : > { %v857_v45 = vcombine.high %v856_v42, %v856_v42  ;;  %v864_v46 = vrot.slane %v856_v42, %v855_v39 }
 0x480   : > { %878 = vxpose.xlu1.b32.start.end [1/1] (short) (narrow) %v864_v46, 8  ;;  %v3424_v47 = vrot.slane %v857_v45, %v855_v39  ;;  %v1029_v48 = vrot.slane %v864_v46, %v3422_v43  ;;  %v872_v57 = vcombine.high %v864_v46, %v864_v46  ;;  %v1950_v46 = vld [vmem:[#allocation2 + $0x2] ss:$0 sm:$0xff] }
 0x482   : > { %910 = vxpose.xlu0.b32.start.end [1/1] (short) (narrow) %v3424_v47, 8  ;;  %v3430_v49 = vcombine.high %v3424_v47, %v3424_v47  ;;  %v1033_v50 = vrot.slane %v3424_v47, %v3422_v43  ;;  %v1037_v19 = vrot.slane %v872_v57, %v3422_v43 }
 0x484   : > { %v1041_v51 = vrot.slane %v3430_v49, %v3422_v43 }
 0x486   : > { %974 = vxpose.xlu0.b32.start.end [1/1] (short) (narrow) %v3430_v49, 8  ;;  %v1951_v49 = vld [vmem:[#allocation2 + $0x3] ss:$0 sm:$0xff] }
 0x49e   : > { %708 = vrot.lane.b32.xlu1 %v3438_v55, %s2806_s10 }
 0x4af   : > { %2257 = vset.pattern.permute.xlu0 %v2807_v56 }
 0x4c7   : > { %942 = vxpose.xlu1.b32.start.end [1/1] (short) (narrow) %v872_v57, 8 }
 0x4e5   : > { %2258 = vset.pattern.permute.xlu1 %v2807_v56 }
 0x500   : > { %v894_v58 = vpop.trf.xlu1 }
 0x501   : > { %1008 = vperm.xlu0 %2257, %v894_v58   ;;  %v1073_v4 = vmul.f32 1.442695, %v894_v58 }
 0x502   : > { %v926_v59 = vpop.trf.xlu0 }
 0x503   : > { %v1075_v60 = vmul.f32 1.442695, %v926_v59  ;;  %1013 = vperm.xlu1 %2258, %v926_v59  }
 0x505   : > { %2269 = vpow2.f32 %v1075_v60 }
 0x506   : > { %v990_v61 = vpop.trf.xlu0 }
 0x507   : > { %v1079_v62 = vmul.f32 1.442695, %v990_v61 }
 0x509   : > { %2271 = vpow2.f32 %v1079_v62 }
 0x50a   : > { %2273 = vpow2.f32 %v1073_v4 }
 0x50f   : > { %v2270_v63 = vpop.eup %2269 }
 0x510   : > { %v709_v0 = vpop.permute.xlu1 %708  ;;  %1092 = vperm.xlu1 %2258, %v2270_v63  }
 0x511   : > { %v711_v1 = vmul.f32 %v709_v0, %v3410_v10 }
 0x513   : > { %v2272_v2 = vpop.eup %2271  ;;  %2009 = vmatpush3.msra.mxu1 %v711_v1 }
 0x514   : > { %1102 = vperm.xlu1 %2258, %v2272_v2   ;;  %2013 = vmatprep.subr.mxu1 %v2802_v5  ;;  %v2274_v7 = vpop.eup %2273 }
 0x547   : > { %v958_v3 = vpop.trf.xlu1 }
 0x548   : > { %1018 = vperm.xlu0 %2257, %v958_v3   ;;  %v1077_v6 = vmul.f32 1.442695, %v958_v3 }
 0x54a   : > { %2275 = vpow2.f32 %v1077_v6 }
 0x54c   : > { %1023 = vperm.xlu0 %2257, %v990_v61  }
 0x550   : > { %1064 = vrot.lane.b32.xlu0 %v711_v1, %s2808_s24 }
 0x554   : > { %1067 = vrot.lane.b32.xlu0 %v711_v1, %s2809_s29  ;;  %v2276_v8 = vpop.eup %2275 }
 0x558   : > { %1070 = vrot.lane.b32.xlu0 %v711_v1, %s2810_s17 }
 0x55c   : > { %1087 = vperm.xlu0 %2257, %v2274_v7  }
 0x560   : > { %1097 = vperm.xlu0 %2257, %v2276_v8  }
 0x580   : > { %v1009_v10 = vpop.permute.xlu0 %1008 }
 0x581   : > { %v1046_v11 = vsub.f32 %v1009_v10, %v1029_v48 }
 0x582   : > { %v1014_v15 = vpop.permute.xlu1 %1013 }
 0x583   : > { %v1051_v12 = vadd.f32 %v1050_v9, %v1046_v11  ;;  %v1047_v16 = vsub.f32 %v1014_v15, %v1033_v50 }
 0x585   : > { %v1055_v13 = vmul.f32 1.442695, %v1051_v12  ;;  %v1052_v17 = vadd.f32 %v1050_v9, %v1047_v16 }
 0x587   : > { %2277 = vpow2.f32 %v1055_v13  ;;  %v1057_v18 = vmul.f32 1.442695, %v1052_v17 }
 0x589   : > { %2279 = vpow2.f32 %v1057_v18 }
 0x58f   : > { %v1093_v41 = vpop.permute.xlu1 %1092 }
 0x590   : > { %v1130_v42 = vmul.f32 %v1949_v40, %v1093_v41 }
 0x591   : > { %v2278_v14 = vpop.eup %2277 }
 0x592   : > { %2011 = vmatmul.mubr.msk.f32.vlgmr.msra.gmra.mrb[0].mxu1 %vm775_vm5, %v2278_v14 }
 0x593   : > { %2015 = vmatprep.mubr.msk.f32.mxu1 %vm2803_vm1, %v2802_v5  ;;  %v2280_v28 = vpop.eup %2279  ;;  %v1103_v50 = vpop.permute.xlu1 %1102 }
 0x594   : > { %v1132_v54 = vmul.f32 %v1951_v49, %v1103_v50 }
 0x5c7   : > { %v1019_v20 = vpop.permute.xlu0 %1018 }
 0x5c8   : > { %v1048_v21 = vsub.f32 %v1019_v20, %v1037_v19 }
 0x5ca   : > { %v1053_v22 = vadd.f32 %v1050_v9, %v1048_v21 }
 0x5cb   : > { %v1024_v23 = vpop.permute.xlu0 %1023 }
 0x5cc   : > { %v1059_v24 = vmul.f32 1.442695, %v1053_v22  ;;  %v1049_v25 = vsub.f32 %v1024_v23, %v1041_v51 }
 0x5ce   : > { %2281 = vpow2.f32 %v1059_v24  ;;  %v1054_v26 = vadd.f32 %v1050_v9, %v1049_v25 }
 0x5cf   : > { %v1065_v27 = vpop.permute.xlu0 %1064 }
 0x5d0   : > { %v1061_v29 = vmul.f32 1.442695, %v1054_v26  ;;  %2014 = vmatpush3.msra.mxu1 %v1065_v27 }
 0x5d1   : > { %2016 = vmatmul.mubr.msk.f32.vlgmr.msra.gmra.mrb[2].mxu1 %vm775_vm5, %v2280_v28  ;;  %2018 = vmatprep.subr.mxu1 %v2802_v5 }
 0x5d2   : > { %2283 = vpow2.f32 %v1061_v29  ;;  %2020 = vmatprep.mubr.msk.f32.mxu1 %vm2803_vm1, %v2802_v5 }
 0x5d3   : > { %v1068_v30 = vpop.permute.xlu0 %1067 }
 0x5d4   : > { %2019 = vmatpush3.msra.mxu1 %v1068_v30 }
 0x5d7   : > { %v1071_v31 = vpop.permute.xlu0 %1070 }
 0x5d8   : > { %v2282_v32 = vpop.eup %2281  ;;  %2024 = vmatpush3.msra.mxu0 %v1071_v31 }
 0x5d9   : > { %2021 = vmatmul.mubr.msk.f32.vlgmr.msra.gmra.mrb[4].mxu1 %vm775_vm5, %v2282_v32 }
 0x5db   : > { %v1088_v35 = vpop.permute.xlu0 %1087 }
 0x5dc   : > { %v2284_v33 = vpop.eup %2283  ;;  %v1129_v36 = vmul.f32 %v1948_v34, %v1088_v35 }
 0x5dd   : > { %2026 = vmatmul.mubr.msk.f32.vlgmr.msra.gmra.mrb[6].mxu0 %vm775_vm5, %v2284_v33 }
 0x5df   : > { %v1098_v47 = vpop.permute.xlu0 %1097 }
 0x5e0   : > { %v1131_v48 = vmul.f32 %v1950_v46, %v1098_v47 }
 0x665   : > { %v1202_v37 = vpop.f32.mrb[0].mxu1 }
 0x666   : > { %v1203_v38 = vadd.f32 %v1202_v37, %v1129_v36  ;;  %v2012_v39 = vpop.f32.mrb[1].mxu1 }
 0x668   : > { %1426 = vst.msk [vmem:[#allocation2 - $0x7] sm:$0x80] %vm1425_vm6, %v1203_v38  ;;  %1434 = vst.msk [vmem:[%s3395_s12 - $0x7] sm:$0x80] (!%p1956_p2), %vm1425_vm6, %v1203_v38 }
 0x6a4   : > { %v1275_v43 = vpop.f32.mrb[2].mxu1 }
 0x6a5   : > { %v1276_v44 = vadd.f32 %v1275_v43, %v1130_v42  ;;  %v2017_v45 = vpop.f32.mrb[3].mxu1 }
 0x6a7   : > { %1427 = vst.msk [vmem:[#allocation2 - $0x6] sm:$0x80] %vm1425_vm6, %v1276_v44  ;;  %1435 = vst.msk [vmem:[%s3395_s12 - $0x6] sm:$0x80] (!%p1956_p2), %vm1425_vm6, %v1276_v44 }
 0x6ac   : > { %v1348_v51 = vpop.f32.mrb[4].mxu1 }
 0x6ad   : > { %v1349_v52 = vadd.f32 %v1348_v51, %v1131_v48  ;;  %v2022_v53 = vpop.f32.mrb[5].mxu1  ;;  %1433 = sbr.rel (%p1956_p2) target bundleno = 1716 (0x6b4), region = 116 }
 0x6af   : > { %1428 = vst.msk [vmem:[#allocation2 - $0x5] sm:$0x80] %vm1425_vm6, %v1349_v52  ;;  %1436 = vst.msk [vmem:[%s3395_s12 - $0x5] sm:$0x80] (!%p1956_p2), %vm1425_vm6, %v1349_v52 }
 0x6b0   : > { %v1421_v56 = vpop.f32.mrb[6].mxu0 }
 0x6b1   : > { %v1422_v57 = vadd.f32 %v1421_v56, %v1132_v54  ;;  %v2027_v58 = vpop.f32.mrb[7].mxu0 }
 0x6b3   : > { %1429 = vst.msk [vmem:[#allocation2 - $0x4] sm:$0x80] %vm1425_vm6, %v1422_v57  ;;  %1437 = vst.msk [vmem:[%s3395_s12 - $0x4] sm:$0x80] (!%p1956_p2), %vm1425_vm6, %v1422_v57 }
 0x6b4 PF: > { %v1441_v59 = vsel %vm775_vm5, %v1276_v44, 0.0  ;;  %v1447_v60 = vsel %vm775_vm5, %v1422_v57, 0.0  ;;  %2028 = vmatprep.subr.bf16.mxu1 %v2802_v5  ;;  %2032 = vmatprep.mubr.msk.bf16.mxu1 %vm2803_vm1, %v2802_v5  ;;  %v1444_v61 = vsel %vm775_vm5, %v1349_v52, 0.0  ;;  %v1438_v62 = vsel %vm775_vm5, %v1203_v38, 0.0  ;;  %v2285_v29 = vld [vmem:[#allocation9] sm:$0xff]   ;;  %v2286_v33 = vld [vmem:[#allocation9 + $0x8] sm:$0xff]  }
 0x6b5   : > { %1442 = vadd.xlane.f32.xlu0 %v1441_v59  ;;  %1448 = vadd.xlane.f32.xlu1 %v1447_v60  ;;  %v1958_v31 = vld [vmem:[#allocation14 + $0x1] ss:$0 sm:$0xff]  ;;  %v1962_v34 = vld [vmem:[#allocation15 + $0x1] ss:$0 sm:$0xff]  ;;  %v1959_v39 = vld [vmem:[#allocation14 + $0x2] ss:$0 sm:$0xff] }
 0x6b6   : > { %2029 = vmatpush3.bf16.msra.mxu1 %v2285_v29  ;;  %v1960_v41 = vld [vmem:[#allocation14 + $0x3] ss:$0 sm:$0xff]  ;;  %s2811_s26 = smov 8   ;;  %s2812_s8 = smov 16   ;;  %v1961_v59 = vld [vmem:[#allocation15] ss:$0 sm:$0xff] }
 0x6b7   : > { %2030 = vmatprep.subr.bf16.mxu1 %v2802_v5  ;;  %v1964_v5 = vld [vmem:[#allocation15 + $0x3] ss:$0 sm:$0xff]  ;;  %s2813_s2 = smov 24   ;;  %s2814_s9 = smov 64   ;;  %vm1571_vm7 = vcmask 130048   ;;  %vm1574_vm8 = vcmask 195584  }
 0x6b8   : > { %s3717_s1 = sld [smem:[#allocation37_spill]]  ;;  %s1681_s16 = sshll.u32 %s3395_s12, 4  ;;  %s3492_s16 = int_to_ptr.vmem [resolvable:$true] %s1681_s16 }
 0x6b9   : > { %1445 = vadd.xlane.f32.xlu0 %v1444_v61  ;;  %1439 = vadd.xlane.f32.xlu1 %v1438_v62  ;;  %s3718_s20 = sld [smem:[#allocation57_spill]]  ;;  %s3496_s24 = scalar_lea.sflag [#allocation23], %s563_s11 }
 0x6ba   : > { %2031 = vmatpush3.bf16.msra.mxu1 %v2286_v33  ;;  %s2607_s29 = scalar_lea.vmem %s3492_s16, 64  ;;  %p3719_p3 = scmp.ne.s32.totalorder %s3682_s15, 0 }
 0x6bb   : > { %p2608_p12 = scmp.ne.s32.totalorder %s3492_s16, %s2607_s29  ;;  %s2815_s17 = smov [#allocation22]  }
 0x6bc   : > { %s2611_s12 = sshll.u32 %s2815_s17, 4  ;;  %s2612_s12 = int_to_ptr.vmem [resolvable:$false] %s2611_s12 }
 0x6bd   : > { %p2609_p5 = pnand %p2608_p12, %p3719_p3  ;;  %s2613_s18 = scalar_lea.vmem %s2612_s12, 128 }
 0x6be   : > { %s1978_s7 = sshll.u32 %s3717_s1, 6  ;;  %p2614_p10 = scmp.lt.s32.totalorder %s3492_s16, %s2612_s12 }
 0x6bf   : > { %s3490_s10 = scalar_lea.hbm %s3718_s20, %s1978_s7  ;;  %p2610_p8 = pneg %p2609_p5 }
 0x6c0   : > { %p2615_p13 = scmp.lt.s32.totalorder %s2613_s18, %s2607_s29 }
 0x6c2   : > { %p2616_p6 = por %p2615_p13, %p2614_p10 }
 0x6c4   : > { %p2617_p4 = pnand %p2616_p6, %p2610_p8 }
 0x742   : > { %v1443_v63 = vpop.xlane.xlu0 %1442  ;;  %v1449_v0 = vpop.xlane.xlu1 %1448 }
 0x743   : > { %v1452_v1 = vmul.f32 0.125, %v1443_v63  ;;  %v1454_v2 = vmul.f32 0.125, %v1449_v0 }
 0x745   : > { %v1456_v3 = vsub.f32 %v1276_v44, %v1452_v1  ;;  %v1458_v4 = vsub.f32 %v1422_v57, %v1454_v2  ;;  %v1963_v44 = vld [vmem:[#allocation15 + $0x2] ss:$0 sm:$0xff]  ;;  %v1957_v57 = vld [vmem:[#allocation14] ss:$0 sm:$0xff] }
 0x746   : > { %v1446_v6 = vpop.xlane.xlu0 %1445  ;;  %v1440_v7 = vpop.xlane.xlu1 %1439 }
 0x747   : > { %v1453_v8 = vmul.f32 0.125, %v1446_v6  ;;  %v1460_v9 = vmul.f32 %v1456_v3, %v1456_v3  ;;  %v1451_v10 = vmul.f32 0.125, %v1440_v7  ;;  %v1462_v11 = vmul.f32 %v1458_v4, %v1458_v4 }
 0x749   : > { %v1457_v12 = vsub.f32 %v1349_v52, %v1453_v8  ;;  %v1466_v13 = vsel %vm775_vm5, %v1460_v9, 0.0  ;;  %v1455_v14 = vsub.f32 %v1203_v38, %v1451_v10  ;;  %v1472_v15 = vsel %vm775_vm5, %v1462_v11, 0.0 }
 0x74a   : > { %1467 = vadd.xlane.f32.xlu0 %v1466_v13 }
 0x74b   : > { %v1461_v16 = vmul.f32 %v1457_v12, %v1457_v12  ;;  %v1459_v17 = vmul.f32 %v1455_v14, %v1455_v14 }
 0x74d   : > { %v1469_v18 = vsel %vm775_vm5, %v1461_v16, 0.0  ;;  %v1463_v19 = vsel %vm775_vm5, %v1459_v17, 0.0 }
 0x74e   : > { %1473 = vadd.xlane.f32.xlu0 %v1472_v15  ;;  %1470 = vadd.xlane.f32.xlu1 %v1469_v18 }
 0x752   : > { %1464 = vadd.xlane.f32.xlu1 %v1463_v19 }
 0x7d7   : > { %v1468_v20 = vpop.xlane.xlu0 %1467 }
 0x7d8   : > { %v1476_v21 = vmul.f32 0.125, %v1468_v20 }
 0x7da   : > { %v1480_v22 = vadd.f32 1e-05, %v1476_v21 }
 0x7db   : > { %v1474_v23 = vpop.xlane.xlu0 %1473  ;;  %v1471_v24 = vpop.xlane.xlu1 %1470 }
 0x7dc   : > { %2287 = vrsqrt.f32 %v1480_v22  ;;  %v1478_v25 = vmul.f32 0.125, %v1474_v23  ;;  %v1477_v26 = vmul.f32 0.125, %v1471_v24 }
 0x7de   : > { %v1482_v27 = vadd.f32 1e-05, %v1478_v25  ;;  %v1481_v28 = vadd.f32 1e-05, %v1477_v26 }
 0x7df   : > { %v1465_v51 = vpop.xlane.xlu1 %1464 }
 0x7e0   : > { %2289 = vrsqrt.f32 %v1482_v27  ;;  %v1475_v52 = vmul.f32 0.125, %v1465_v51 }
 0x7e1   : > { %2291 = vrsqrt.f32 %v1481_v28 }
 0x7e2   : > { %v1479_v53 = vadd.f32 1e-05, %v1475_v52 }
 0x7e4   : > { %2293 = vrsqrt.f32 %v1479_v53 }
 0x7e6   : > { %v2288_v30 = vpop.eup %2287 }
 0x7e7   : > { %v1488_v32 = vmul.f32 %v2288_v30, %v1456_v3 }
 0x7e9   : > { %v1520_v35 = vmul.f32 %v1958_v31, %v1488_v32 }
 0x7ea   : > { %v2290_v36 = vpop.eup %2289 }
 0x7eb   : > { %v2292_v37 = vpop.eup %2291  ;;  %v1552_v38 = vadd.f32 %v1962_v34, %v1520_v35  ;;  %v1490_v40 = vmul.f32 %v2290_v36, %v1458_v4 }
 0x7ec   : > { %v1489_v42 = vmul.f32 %v2292_v37, %v1457_v12 }
 0x7ed   : > { %v1556_v43 = vpack.c.bf16 %v1552_v38, %v1552_v38  ;;  %v1522_v46 = vmul.f32 %v1960_v41, %v1490_v40 }
 0x7ee   : > { %v1521_v45 = vmul.f32 %v1959_v39, %v1489_v42  ;;  %v2294_v54 = vpop.eup %2293 }
 0x7ef   : > { %1560 = vrot.lane.b32.xlu0 %v1556_v43, %s2811_s26  ;;  %v1554_v49 = vadd.f32 %v1964_v5, %v1522_v46  ;;  %v1487_v56 = vmul.f32 %v2294_v54, %v1455_v14 }
 0x7f0   : > { %v1553_v47 = vadd.f32 %v1963_v44, %v1521_v45 }
 0x7f1   : > { %v1558_v50 = vpack.c.bf16 %v1554_v49, %v1554_v49  ;;  %v1519_v58 = vmul.f32 %v1957_v57, %v1487_v56 }
 0x7f2   : > { %v1557_v48 = vpack.c.bf16 %v1553_v47, %v1553_v47 }
 0x7f3   : > { %v1551_v60 = vadd.f32 %v1961_v59, %v1519_v58 }
 0x7f4   : > { %1563 = vrot.lane.b32.xlu1 %v1557_v48, %s2812_s8 }
 0x7f5   : > { %v1555_v63 = vpack.c.bf16 %v1551_v60, %v1551_v60 }
 0x7f8   : > { %1566 = vrot.lane.b32.xlu1 %v1558_v50, %s2813_s2 }
 0x7fc   : > { %1642 = vrot.lane.b32.xlu1 %v3438_v55, %s2814_s9 }
 0x861   : > { %v1561_v61 = vpop.permute.xlu0 %1560 }
 0x862   : > { %v1570_v55 = vsel %vm775_vm5, %v1555_v63, %v1561_v61 }
 0x866   : > { %v1564_v62 = vpop.permute.xlu1 %1563 }
 0x867   : > { %v1573_v0 = vsel %vm1571_vm7, %v1570_v55, %v1564_v62 }
 0x86a   : > { %v1567_v1 = vpop.permute.xlu1 %1566 }
 0x86b   : > { %v1576_v2 = vsel %vm1574_vm8, %v1573_v0, %v1567_v1 }
 0x86c   : > { %2033 = vmatmul.mubr.msk.bf16.vlgmr.msra.gmra.mrb[8].mxu1 %vm656_vm2, %v1576_v2 }
 0x86d   : > { %2620 = shalt.err (!%p2617_p4)
}
 0x86e   : > { %s2621_s11 = scalar_lea.hbm %s3490_s10, 64  ;;  %s2625_s9 = scalar_lea.hbm %s3718_s20, 128 }
 0x86f   : > { %p2622_p11 = scmp.ne.s32.totalorder %s3490_s10, %s2621_s11  ;;  %p2626_p1 = scmp.lt.u32.totalorder %s3490_s10, %s3718_s20 }
 0x870   : > { %p2627_p0 = scmp.lt.u32.totalorder %s2625_s9, %s2621_s11  ;;  %p2629_p12 = scmp.lt.u32.totalorder %s2621_s11, %s3490_s10 }
 0x871   : > { %p2623_p7 = pnand %p2622_p11, %p3719_p3 }
 0x872   : > { %p2628_p2 = por %p2627_p0, %p2626_p1 }
 0x873   : > { %p2624_p9 = pneg %p2623_p7 }
 0x874   : > { %p2630_p5 = por %p2629_p12, %p2628_p2 }
 0x876   : > { %p2631_p8 = pnand %p2630_p5, %p2624_p9 }
 0x878   : > { %2634 = shalt.err (!%p2631_p8)
}
 0x879   : > { %s2816_s14 = smov 1   ;;  %s3720_s29 = sld [smem:[#allocation36_spill]]  ;;  %v1965_v3 = vld [vmem:[#allocation11] ss:$0 sm:$0xff]  ;;  %v1643_v6 = vpop.permute.xlu1 %1642 }
 0x87a   : > { %2077 = dma.vmem_to_hbm [thread:$0]  (%p3719_p3), %s3492_s16, 64, %s3490_s10, %s3496_s24, %s2812_s8, %s2812_s8, %s2816_s14  }
 0x87b   : > { %s1971_s17 = sshll.u32 %s3717_s1, 1  ;;  %s1668_s11 = sshll.u32 %s3393_s27, 4  ;;  %s3530_s11 = int_to_ptr.vmem [resolvable:$true] %s1668_s11 }
 0x87c   : > { %s3721_s2 = sld [smem:[#allocation56_spill]]  ;;  %s1648_s8 = scalar_lea.sflag [#allocation5], %s3356_s21 }
 0x87d   : > { %s2635_s1 = scalar_lea.vmem %s3530_s11, 128  ;;  %p3722_p10 = scmp.ne.s32.totalorder %s3681_s4, 0 }
 0x87e   : > { %p2636_p3 = scmp.ne.s32.totalorder %s3530_s11, %s2635_s1  ;;  %s2817_s16 = smov [#allocation21]  }
 0x87f   : > { %s1664_s12 = sadd.s32 %s3720_s29, %s1971_s17  ;;  %s2639_s10 = sshll.u32 %s2817_s16, 4  ;;  %s2640_s10 = int_to_ptr.vmem [resolvable:$false] %s2639_s10 }
 0x880   : > { %s1972_s18 = sshll.u32 %s1664_s12, 7  ;;  %p2637_p13 = pnand %p2636_p3, %p3722_p10 }
 0x881   : > { %s2641_s24 = scalar_lea.vmem %s2640_s10, 256  ;;  %p2642_p4 = scmp.lt.s32.totalorder %s3530_s11, %s2640_s10 }
 0x882   : > { %s3528_s9 = scalar_lea.hbm %s3721_s2, %s1972_s18  ;;  %p2638_p6 = pneg %p2637_p13 }
 0x883   : > { %p2643_p11 = scmp.lt.s32.totalorder %s2641_s24, %s2635_s1 }
 0x885   : > { %p2644_p7 = por %p2643_p11, %p2642_p4 }
 0x887   : > { %p2645_p9 = pnand %p2644_p7, %p2638_p6 }
 0x93f   : > { %v1636_v4 = vpop.f32.mrb[8].mxu1 }
 0x940   : > { %v1637_v7 = vadd.f32 %v1965_v3, %v1636_v4  ;;  %v2034_v8 = vpop.f32.mrb[9].mxu1 }
 0x941   : > { %v1639_v9 = vpop.f32.mrb[10].mxu1 }
 0x942   : > { %v1645_v10 = vmul.f32 %v1643_v6, %v1637_v7  ;;  %v2035_v11 = vpop.f32.mrb[11].mxu1 }
 0x944   : > { %1646 = vst.msk [vmem:[%s3393_s27] sm:$0xff] %vm656_vm2, %v1645_v10 }
 0x945   : > { %2648 = shalt.err (!%p2645_p9)
}
 0x946   : > { %s2649_s21 = scalar_lea.hbm %s3528_s9, 128  ;;  %s2653_s28 = scalar_lea.hbm %s3721_s2, 512 }
 0x947   : > { %p2650_p1 = scmp.ne.s32.totalorder %s3528_s9, %s2649_s21  ;;  %p2654_p12 = scmp.lt.u32.totalorder %s3528_s9, %s3721_s2 }
 0x948   : > { %p2655_p5 = scmp.lt.u32.totalorder %s2653_s28, %s2649_s21  ;;  %p2657_p3 = scmp.lt.u32.totalorder %s2649_s21, %s3528_s9 }
 0x949   : > { %p2651_p0 = pnand %p2650_p1, %p3722_p10 }
 0x94a   : > { %p2656_p8 = por %p2655_p5, %p2654_p12 }
 0x94b   : > { %p2652_p2 = pneg %p2651_p0 }
 0x94c   : > { %p2658_p13 = por %p2657_p3, %p2656_p8 }
 0x94e   : > { %p2659_p6 = pnand %p2658_p13, %p2652_p2 }
 0x950   : > { %2662 = shalt.err (!%p2659_p6)
}
 0x951   : > { %2076 = dma.vmem_to_hbm [thread:$0]  (%p3722_p10), %s3530_s11, 128, %s3528_s9, %s1648_s8  }
 0x952 PF: > { %s3723_s17 = sld [smem:[#allocation34_spill]]  ;;  %p2141_p4 = scmp.ge.s32.totalorder %s2785_s13, 2 }
 0x953   : > { %p3724_p11 = scmp.ne.s32.totalorder %s3684_s19, 0 }
 0x955   : > { %p2116_p7 = pnand %p2141_p4, %p3724_p11 }
 0x958   : > { %s1696_s12 = sand.u32 1, %s3723_s17  }
 0x959   : > { %s1697_s18 = scalar_lea.sflag [#allocation5], %s1696_s12 }
 0x95a   : > { %2736 = dma.done.wait (!%p2116_p7), %s1697_s18, 128  }
 0x95b   : > { %2738 = vsyncadd (!%p2116_p7), %s1697_s18, 4294967168  ;;  %s3725_s15 = sld [smem:[#allocation33_spill]]  ;;  %s3726_s26 = sld [smem:[#allocation44_spill]] }
 0x961   : > { %s1705_s1 = sand.u32 1, %s3725_s15   ;;  %p3727_p9 = scmp.ne.s32.totalorder %s3726_s26, 0 }
 0x962   : > { %s1706_s4 = scalar_lea.sflag [#allocation23], %s1705_s1 }
 0x963   : > { %p2119_p1 = pnand %p2141_p4, %p3727_p9 }
 0x965   : > { %2740 = dma.done.wait (!%p2119_p1), %s1706_s4, 64  }
 0x966   : > { %2742 = vsyncadd (!%p2119_p1), %s1706_s4, 4294967232  ;;  %s37_s13 = sadd.s32 1, %s2785_s13   ;;  %s3728_s11 = sld [smem:[#allocation42_spill]] }
 0x967   : > { %p34_p10 = scmp.ge.s32.totalorder %s37_s13, 6   ;;  %s3729_s19 = sld [smem:[#allocation35_spill]] }
 0x968   : > { %s3730_s26 = sld [smem:[#allocation43_spill]]  ;;  %s3731_s27 = sld [smem:[#allocation38_spill]] }
 0x969   : > { %s3732_s29 = sld [smem:[#allocation40_spill]]  ;;  %s3733_s9 = sld [smem:[#allocation41_spill]] }
 0x96a   : > { %s3734_s21 = smov %s2749_s22  ;;  %s3735_s22 = smov %s2753_s23 }
 0x96b   : > { %s3737_s24 = smov %s2761_s25  ;;  %s3739_s28 = smov %s2781_s30 }
 0x96c   : > { %s3736_s23 = smov %s3728_s11  ;;  %36 = sbr.rel (!%p34_p10) target bundleno = 30 (0x1e), region = 181 }
 0x96d   : > { %s3738_s25 = smov %s3729_s19 }
 0x96f   : > { %s3740_s30 = smov %s3733_s9 }
 0x973   :  { %1711 = vsyncpa [#allocation4], 1 }
 0x974   :  { %1713 = vsyncpa [#allocation4 + $0x1], 1 }
 0x975   :  { %1714 = vsyncpa [#allocation7], 1 }
 0x976   :  { %1715 = vsyncpa [#allocation10], 1 }
 0x977   :  { %1716 = vsyncpa [#allocation13], 1 }
 0x978   :  { %1717 = vsyncpa [#allocation16], 1 }
 0x979   :  { %1718 = vsyncpa [#allocation19], 1 }
 0x97a   :  { %1719 = vsyncpa [#allocation5], 1 }
 0x97b   :  { %1721 = vsyncpa [#allocation5 + $0x1], 1 }
 0x97c   :  { %1722 = vsyncpa [#allocation23], 1 }
 0x97d   :  { %1724 = vsyncpa [#allocation23 + $0x1], 1 }

</bundles_post_ra>
